<compile_context>
chip_gen: v7x
topology: tpu7x:2x2x1
jax: 0.10.0
libtpu: 0.0.40
codegen_flags: <defaults>
</compile_context>

<pallas_src>
import math

import jax
import jax.numpy as jnp
from jax import lax
from jax.experimental import pallas as pl
from jax.experimental.pallas import tpu as pltpu


def make_mha_kernel(num_heads, head_dim, batch_block):
    nh, dh, Bt = num_heads, head_dim, batch_block

    def mha_kernel(vlen_ref,                          # scalar-prefetch (SMEM): (B,) int32
                   q_ref, k_ref, v_ref,               # (Bt,Sq,Dq) (Bt,Sk,Dk) (Bt,Sk,Dv) f32
                   wq_ref, wk_ref, wv_ref, wo_ref,    # (nh,Dq,dh) (nh,Dk,dh) (nh,Dv,dh) (nh,dh,Hp) bf16
                   o_ref):                            # (Bt,Sq,Hp) f32
        b0 = pl.program_id(0) * Bt
        Sq = q_ref.shape[1]
        Sk = k_ref.shape[1]
        Dq = q_ref.shape[2]
        Dk = k_ref.shape[2]
        Dv = v_ref.shape[2]

        col = lax.broadcasted_iota(jnp.int32, (Sq, Sk), 1)

        # Static unroll over the (small) per-step batch block: amortizes the
        # per-grid-step pipeline overhead while each iteration's temporaries
        # stay small.
        for i in range(Bt):
            vl = vlen_ref[b0 + i]
            key_mask = col < vl                       # d2l masked-softmax mask

            qb = q_ref[i].astype(jnp.bfloat16)        # (Sq, Dq)
            kb = k_ref[i].astype(jnp.bfloat16)        # (Sk, Dk)
            vb = v_ref[i].astype(jnp.bfloat16)        # (Sk, Dv)

            # Per-head projections as head-batched matmuls (weights pre-split
            # in the wrapper).  Same FLOPs as one fat (S,D)x(D,H) matmul, but
            # the head axis is a leading batch dim -> no lane slicing later.
            # 1/sqrt(dh) is already folded into wq.
            qh = jnp.einsum('hsd,hdf->hsf',
                            jnp.broadcast_to(qb, (nh, Sq, Dq)), wq_ref[...],
                            preferred_element_type=jnp.float32)      # (nh,Sq,dh)
            kh = jnp.einsum('hsd,hdf->hsf',
                            jnp.broadcast_to(kb, (nh, Sk, Dk)), wk_ref[...],
                            preferred_element_type=jnp.float32)      # (nh,Sk,dh)
            vh = jnp.einsum('hsd,hdf->hsf',
                            jnp.broadcast_to(vb, (nh, Sk, Dv)), wv_ref[...],
                            preferred_element_type=jnp.float32)      # (nh,Sk,dh)

            # Scores for all heads at once; contraction on the last dims so no
            # K transpose is materialized.  bf16 MXU inputs, f32 accumulation.
            scores = jnp.einsum('hqd,hkd->hqk',
                                qh.astype(jnp.bfloat16),
                                kh.astype(jnp.bfloat16),
                                preferred_element_type=jnp.float32)  # (nh,Sq,Sk)
            scores = jnp.where(key_mask[None], scores, jnp.float32(-1e6))

            # Softmax in f32; normalization deferred past the value matmul so
            # the scale touches (nh,Sq,dh) instead of (nh,Sq,Sk).
            m = jnp.max(scores, axis=-1, keepdims=True)
            e = jnp.exp(scores - m)                                  # (nh,Sq,Sk)
            denom = jnp.sum(e, axis=-1, keepdims=True)               # (nh,Sq,1)

            ho = jnp.einsum('hqk,hkd->hqd',
                            e.astype(jnp.bfloat16),
                            vh.astype(jnp.bfloat16),
                            preferred_element_type=jnp.float32)      # (nh,Sq,dh)
            # approx reciprocal lowers to the (otherwise idle) EUP slot.
            ho = ho * pl.reciprocal(denom, approx=True)

            # Output projection: per-head (Sq,dh)x(dh,Hp) matmuls summed over
            # heads == concat(heads) @ W_o, without a concat scratch or
            # masked partial stores.
            out_i = jnp.einsum('hqd,hdo->hqo',
                               ho.astype(jnp.bfloat16), wo_ref[...],
                               preferred_element_type=jnp.float32)   # (nh,Sq,Hp)
            o_ref[i] = jnp.sum(out_i, axis=0).astype(o_ref.dtype)

            # TODO(synk): dropout on attention weights omitted (dropout=0.0 / eval).

    return mha_kernel


def multi_head_attention(queries, keys, values, valid_lens,
                         WqT, WkT, WvT, WoT, num_heads, batch_block=None):
    B, Sq, Dq = queries.shape
    _, Sk, Dk = keys.shape
    _, _, Dv = values.shape
    H = WqT.shape[1]
    assert H % num_heads == 0
    dh = H // num_heads
    scale = 1.0 / math.sqrt(dh)

    # Lane-dense output: pad W_o's output dim to a multiple of 128 so the
    # kernel writes full 128-lane slabs; the wrapper slices the padding off.
    Hp = ((H + 127) // 128) * 128
    WoT_p = jnp.pad(WoT, ((0, 0), (0, Hp - H))) if Hp != H else WoT

    # Pre-split weights per head (head axis leading), fold the 1/sqrt(dh)
    # scale into W_q, and store in bf16 for the MXU (halves resident weight
    # VMEM; matters most under v7x's 64 MiB VMEM).
    def split_heads_w(w):                             # (D, H) -> (nh, D, dh)
        D = w.shape[0]
        return jnp.transpose(w.reshape(D, num_heads, dh), (1, 0, 2))

    wq_h = split_heads_w(WqT * scale).astype(jnp.bfloat16)   # (nh, Dq, dh)
    wk_h = split_heads_w(WkT).astype(jnp.bfloat16)           # (nh, Dk, dh)
    wv_h = split_heads_w(WvT).astype(jnp.bfloat16)           # (nh, Dv, dh)
    wo_h = WoT_p.reshape(num_heads, dh, Hp).astype(jnp.bfloat16)  # (nh, dh, Hp)

    valid_lens = valid_lens.astype(jnp.int32)

    # Batch blocking: amortize per-grid-step overhead when per-batch work is
    # tiny; otherwise one batch element per "parallel" step (megacore).
    if batch_block is None:
        tiny = (num_heads * Sq * Sk <= 4096) and (Sq * max(Dq, H) <= 8192)
        batch_block = B if (tiny and B <= 8) else 1
    assert B % batch_block == 0, "batch_block must divide the batch size"
    Bt = batch_block
    grid = (B // Bt,)

    kernel = make_mha_kernel(num_heads, dh, Bt)

    grid_spec = pltpu.PrefetchScalarGridSpec(
        num_scalar_prefetch=1,
        grid=grid,
        in_specs=[
            pl.BlockSpec((Bt, Sq, Dq), lambda g, vl: (g, 0, 0)),       # queries
            pl.BlockSpec((Bt, Sk, Dk), lambda g, vl: (g, 0, 0)),       # keys
            pl.BlockSpec((Bt, Sk, Dv), lambda g, vl: (g, 0, 0)),       # values
            pl.BlockSpec((num_heads, Dq, dh), lambda g, vl: (0, 0, 0)),  # Wq (resident)
            pl.BlockSpec((num_heads, Dk, dh), lambda g, vl: (0, 0, 0)),  # Wk (resident)
            pl.BlockSpec((num_heads, Dv, dh), lambda g, vl: (0, 0, 0)),  # Wv (resident)
            pl.BlockSpec((num_heads, dh, Hp), lambda g, vl: (0, 0, 0)),  # Wo (resident)
        ],
        out_specs=pl.BlockSpec((Bt, Sq, Hp), lambda g, vl: (g, 0, 0)),
    )

    # Advisory cost estimate for XLA scheduling around the kernel.
    flops = 2 * B * (Sq * Dq * H + Sk * Dk * H + Sk * Dv * H
                     + 2 * num_heads * Sq * Sk * dh
                     + Sq * H * Hp)
    transcendentals = B * num_heads * Sq * (Sk + 1)            # exp + reciprocal
    bytes_accessed = (4 * B * (Sq * Dq + Sk * Dk + Sk * Dv + Sq * Hp) + 4 * B
                      + 2 * (num_heads * dh * (Dq + Dk + Dv) + H * Hp))

    # Explicit VMEM budget (double-buffered activation blocks + resident bf16
    # weights + per-step f32 temporaries) with generous headroom.
    act_bytes = 4 * Bt * (Sq * Dq + Sk * Dk + Sk * Dv + Sq * Hp)
    w_bytes = 2 * (num_heads * dh * (Dq + Dk + Dv) + H * Hp)
    tmp_bytes = 4 * num_heads * (Sq * (3 * Sk + 4 * dh) + Sq * Hp)
    vmem_limit = int(min(100 * 2 ** 20,
                         max(32 * 2 ** 20,
                             3 * (2 * (act_bytes + w_bytes) + tmp_bytes))))

    out = pl.pallas_call(
        kernel,
        out_shape=jax.ShapeDtypeStruct((B, Sq, Hp), jnp.float32),
        grid_spec=grid_spec,
        compiler_params=pltpu.CompilerParams(
            dimension_semantics=("parallel",),
            vmem_limit_bytes=vmem_limit),
        cost_estimate=pl.CostEstimate(flops=flops,
                                      transcendentals=transcendentals,
                                      bytes_accessed=bytes_accessed),
    )(valid_lens, queries, keys, values, wq_h, wk_h, wv_h, wo_h)

    return out[..., :H] if Hp != H else out


def reference_mha(queries, keys, values, valid_lens, WqT, WkT, WvT, WoT, num_heads):
    """Pure-JAX f32 reference matching the PyTorch module semantics."""
    B, Sq, _ = queries.shape
    Sk = keys.shape[1]
    H = WqT.shape[1]
    dh = H // num_heads

    Q = queries @ WqT
    K = keys @ WkT
    V = values @ WvT

    def split(x):
        b, s, _ = x.shape
        return x.reshape(b, s, num_heads, dh).transpose(0, 2, 1, 3)  # (B, nh, S, dh)

    Qh, Kh, Vh = split(Q), split(K), split(V)
    scores = jnp.einsum('bhqd,bhkd->bhqk', Qh, Kh) / math.sqrt(dh)
    mask = jnp.arange(Sk)[None, None, None, :] < valid_lens[:, None, None, None]
    scores = jnp.where(mask, scores, -1e6)
    attn = jax.nn.softmax(scores, axis=-1)
    out = jnp.einsum('bhqk,bhkd->bhqd', attn, Vh)
    out = out.transpose(0, 2, 1, 3).reshape(B, Sq, H)
    return out @ WoT


if __name__ == "__main__":
    # Small shapes consistent with the module's forward.
    B, Sq, Sk = 2, 8, 8
    query_size = key_size = value_size = 16
    num_hiddens, num_heads = 32, 4

    key = jax.random.PRNGKey(0)
    kq, kk, kv, kwq, kwk, kwv, kwo = jax.random.split(key, 7)

    queries = jax.random.normal(kq, (B, Sq, query_size), dtype=jnp.float32)
    keys = jax.random.normal(kk, (B, Sk, key_size), dtype=jnp.float32)
    values = jax.random.normal(kv, (B, Sk, value_size), dtype=jnp.float32)
    valid_lens = jnp.array([3, 6], dtype=jnp.int32)

    # nn.Linear(in, out, bias=False): weight (out, in); stored here transposed (in, out).
    def init_linear(k, fan_in, fan_out):
        bound = 1.0 / math.sqrt(fan_in)
        return jax.random.uniform(k, (fan_in, fan_out), jnp.float32, -bound, bound)

    WqT = init_linear(kwq, query_size, num_hiddens)
    WkT = init_linear(kwk, key_size, num_hiddens)
    WvT = init_linear(kwv, value_size, num_hiddens)
    WoT = init_linear(kwo, num_hiddens, num_hiddens)

    out = multi_head_attention(queries, keys, values, valid_lens,
                               WqT, WkT, WvT, WoT, num_heads)
    out = jax.block_until_ready(out)

    ref = reference_mha(queries, keys, values, valid_lens,
                        WqT, WkT, WvT, WoT, num_heads)
    assert out.shape == ref.shape, f"shape mismatch: {out.shape} vs {ref.shape}"
    # Tolerance relaxed vs. the all-f32 version: MXU operands are bf16
    # (f32 accumulation), softmax math stays f32.
    assert jnp.allclose(out, ref, atol=2e-2, rtol=2e-2), \
        f"mismatch: max abs err {jnp.max(jnp.abs(out - ref))}"

    print("KERNEL_OK")
</pallas_src>

<mosaic_0001>
module attributes {stable_mosaic.version = 11 : i64} {
  func.func @mha_kernel(%arg0: i32, %arg1: memref<2xi32, #tpu.memory_space<smem>>, %arg2: memref<2x8x16xf32, #tpu.memory_space<vmem>>, %arg3: memref<2x8x16xf32, #tpu.memory_space<vmem>>, %arg4: memref<2x8x16xf32, #tpu.memory_space<vmem>>, %arg5: memref<4x16x8xbf16, #tpu.memory_space<vmem>>, %arg6: memref<4x16x8xbf16, #tpu.memory_space<vmem>>, %arg7: memref<4x16x8xbf16, #tpu.memory_space<vmem>>, %arg8: memref<4x8x128xbf16, #tpu.memory_space<vmem>>, %arg9: memref<2x8x128xf32, #tpu.memory_space<vmem>>) attributes {dimension_semantics = [#tpu.dimension_semantics<parallel>], iteration_bounds = array<i64: 1>, scalar_prefetch = 1 : i64, scratch_operands = 0 : i64, tpu.core_type = #tpu.core_type<tc>, window_params = [{transform_indices = @transform_0, window_bounds = array<i64: 2, 8, 16>}, {transform_indices = @transform_1, window_bounds = array<i64: 2, 8, 16>}, {transform_indices = @transform_2, window_bounds = array<i64: 2, 8, 16>}, {pipeline_mode = #tpu.pipeline_mode<synchronous>, transform_indices = @transform_3, window_bounds = array<i64: 4, 16, 8>}, {pipeline_mode = #tpu.pipeline_mode<synchronous>, transform_indices = @transform_4, window_bounds = array<i64: 4, 16, 8>}, {pipeline_mode = #tpu.pipeline_mode<synchronous>, transform_indices = @transform_5, window_bounds = array<i64: 4, 16, 8>}, {pipeline_mode = #tpu.pipeline_mode<synchronous>, transform_indices = @transform_6, window_bounds = array<i64: 4, 8, 128>}, {transform_indices = @transform_7, window_bounds = array<i64: 2, 8, 128>}]} {
    %c2_i32 = arith.constant 2 : i32
    %0 = arith.muli %arg0, %c2_i32 : i32
    %1 = tpu.iota {dimensions = array<i32: 1>} : vector<8x8xi32>
    %c0_i32 = arith.constant 0 : i32
    %2 = arith.addi %0, %c0_i32 : i32
    %3 = arith.index_cast %2 : i32 to index
    %4 = memref.load %arg1[%3] : memref<2xi32, #tpu.memory_space<smem>>
    %5 = vector.broadcast %4 : i32 to vector<8x8xi32>
    %6 = arith.cmpi slt, %1, %5 : vector<8x8xi32>
    %c0 = arith.constant 0 : index
    %c0_0 = arith.constant 0 : index
    %c0_1 = arith.constant 0 : index
    %7 = vector.load %arg2[%c0, %c0_0, %c0_1] : memref<2x8x16xf32, #tpu.memory_space<vmem>>, vector<1x8x16xf32>
    %8 = vector.shape_cast %7 : vector<1x8x16xf32> to vector<8x16xf32>
    %9 = arith.truncf %8 : vector<8x16xf32> to vector<8x16xbf16>
    %c0_2 = arith.constant 0 : index
    %c0_3 = arith.constant 0 : index
    %c0_4 = arith.constant 0 : index
    %10 = vector.load %arg3[%c0_2, %c0_3, %c0_4] : memref<2x8x16xf32, #tpu.memory_space<vmem>>, vector<1x8x16xf32>
    %11 = vector.shape_cast %10 : vector<1x8x16xf32> to vector<8x16xf32>
    %12 = arith.truncf %11 : vector<8x16xf32> to vector<8x16xbf16>
    %c0_5 = arith.constant 0 : index
    %c0_6 = arith.constant 0 : index
    %c0_7 = arith.constant 0 : index
    %13 = vector.load %arg4[%c0_5, %c0_6, %c0_7] : memref<2x8x16xf32, #tpu.memory_space<vmem>>, vector<1x8x16xf32>
    %14 = vector.shape_cast %13 : vector<1x8x16xf32> to vector<8x16xf32>
    %15 = arith.truncf %14 : vector<8x16xf32> to vector<8x16xbf16>
    %16 = vector.shape_cast %9 : vector<8x16xbf16> to vector<1x8x16xbf16>
    %17 = vector.broadcast %16 : vector<1x8x16xbf16> to vector<4x8x16xbf16>
    %c0_8 = arith.constant 0 : index
    %c0_9 = arith.constant 0 : index
    %c0_10 = arith.constant 0 : index
    %18 = vector.load %arg5[%c0_8, %c0_9, %c0_10] : memref<4x16x8xbf16, #tpu.memory_space<vmem>>, vector<4x16x8xbf16>
    "tpu.trace_start"() <{level = 10 : i32, message = "hsd,hdf->hsf"}> : () -> ()
    %cst = arith.constant dense<0.000000e+00> : vector<4x8x8xf32>
    %19 = tpu.matmul %17, %18, %cst {dimension_numbers = #tpu.dot_dimension_numbers<[2], [1], [1], [2], [0, 0, 0, 1, 1, 2], [0], [0]>} : vector<4x8x16xbf16>, vector<4x16x8xbf16>, vector<4x8x8xf32> -> vector<4x8x8xf32>
    "tpu.trace_stop"() : () -> ()
    %20 = vector.shape_cast %12 : vector<8x16xbf16> to vector<1x8x16xbf16>
    %21 = vector.broadcast %20 : vector<1x8x16xbf16> to vector<4x8x16xbf16>
    %c0_11 = arith.constant 0 : index
    %c0_12 = arith.constant 0 : index
    %c0_13 = arith.constant 0 : index
    %22 = vector.load %arg6[%c0_11, %c0_12, %c0_13] : memref<4x16x8xbf16, #tpu.memory_space<vmem>>, vector<4x16x8xbf16>
    "tpu.trace_start"() <{level = 10 : i32, message = "hsd,hdf->hsf"}> : () -> ()
    %cst_14 = arith.constant dense<0.000000e+00> : vector<4x8x8xf32>
    %23 = tpu.matmul %21, %22, %cst_14 {dimension_numbers = #tpu.dot_dimension_numbers<[2], [1], [1], [2], [0, 0, 0, 1, 1, 2], [0], [0]>} : vector<4x8x16xbf16>, vector<4x16x8xbf16>, vector<4x8x8xf32> -> vector<4x8x8xf32>
    "tpu.trace_stop"() : () -> ()
    %24 = vector.shape_cast %15 : vector<8x16xbf16> to vector<1x8x16xbf16>
    %25 = vector.broadcast %24 : vector<1x8x16xbf16> to vector<4x8x16xbf16>
    %c0_15 = arith.constant 0 : index
    %c0_16 = arith.constant 0 : index
    %c0_17 = arith.constant 0 : index
    %26 = vector.load %arg7[%c0_15, %c0_16, %c0_17] : memref<4x16x8xbf16, #tpu.memory_space<vmem>>, vector<4x16x8xbf16>
    "tpu.trace_start"() <{level = 10 : i32, message = "hsd,hdf->hsf"}> : () -> ()
    %cst_18 = arith.constant dense<0.000000e+00> : vector<4x8x8xf32>
    %27 = tpu.matmul %25, %26, %cst_18 {dimension_numbers = #tpu.dot_dimension_numbers<[2], [1], [1], [2], [0, 0, 0, 1, 1, 2], [0], [0]>} : vector<4x8x16xbf16>, vector<4x16x8xbf16>, vector<4x8x8xf32> -> vector<4x8x8xf32>
    "tpu.trace_stop"() : () -> ()
    %28 = arith.truncf %19 : vector<4x8x8xf32> to vector<4x8x8xbf16>
    %29 = arith.truncf %23 : vector<4x8x8xf32> to vector<4x8x8xbf16>
    "tpu.trace_start"() <{level = 10 : i32, message = "hqd,hkd->hqk"}> : () -> ()
    %cst_19 = arith.constant dense<0.000000e+00> : vector<4x8x8xf32>
    %30 = tpu.matmul %28, %29, %cst_19 {dimension_numbers = #tpu.dot_dimension_numbers<[2], [2], [1], [1], [0, 0, 0, 1, 1, 1], [0], [0]>} : vector<4x8x8xbf16>, vector<4x8x8xbf16>, vector<4x8x8xf32> -> vector<4x8x8xf32>
    "tpu.trace_stop"() : () -> ()
    %31 = vector.shape_cast %6 : vector<8x8xi1> to vector<1x8x8xi1>
    %cst_20 = arith.constant -1.000000e+06 : f32
    %32 = vector.shape_cast %31 : vector<1x8x8xi1> to vector<1x8x8xi1>
    %33 = vector.broadcast %32 : vector<1x8x8xi1> to vector<4x8x8xi1>
    %34 = vector.broadcast %cst_20 : f32 to vector<4x8x8xf32>
    %35 = arith.select %33, %30, %34 : vector<4x8x8xi1>, vector<4x8x8xf32>
    %cst_21 = arith.constant dense<0xFF800000> : vector<4x8xf32>
    %36 = vector.multi_reduction <maximumf>, %35, %cst_21 [2] : vector<4x8x8xf32> to vector<4x8xf32>
    %37 = vector.shape_cast %36 : vector<4x8xf32> to vector<4x8x1xf32>
    %38 = vector.broadcast %37 : vector<4x8x1xf32> to vector<4x8x8xf32>
    %39 = arith.subf %35, %38 : vector<4x8x8xf32>
    %40 = math.exp %39 : vector<4x8x8xf32>
    %cst_22 = arith.constant dense<0.000000e+00> : vector<4x8xf32>
    %41 = vector.multi_reduction <add>, %40, %cst_22 [2] : vector<4x8x8xf32> to vector<4x8xf32>
    %42 = vector.shape_cast %41 : vector<4x8xf32> to vector<4x8x1xf32>
    %43 = arith.truncf %40 : vector<4x8x8xf32> to vector<4x8x8xbf16>
    %44 = arith.truncf %27 : vector<4x8x8xf32> to vector<4x8x8xbf16>
    "tpu.trace_start"() <{level = 10 : i32, message = "hqk,hkd->hqd"}> : () -> ()
    %cst_23 = arith.constant dense<0.000000e+00> : vector<4x8x8xf32>
    %45 = tpu.matmul %43, %44, %cst_23 {dimension_numbers = #tpu.dot_dimension_numbers<[2], [1], [1], [2], [0, 0, 0, 1, 1, 2], [0], [0]>} : vector<4x8x8xbf16>, vector<4x8x8xbf16>, vector<4x8x8xf32> -> vector<4x8x8xf32>
    "tpu.trace_stop"() : () -> ()
    %46 = tpu.reciprocal %42 {approx = true} : vector<4x8x1xf32> -> vector<4x8x1xf32>
    %47 = vector.broadcast %46 : vector<4x8x1xf32> to vector<4x8x8xf32>
    %48 = arith.mulf %45, %47 : vector<4x8x8xf32>
    %49 = arith.truncf %48 : vector<4x8x8xf32> to vector<4x8x8xbf16>
    %c0_24 = arith.constant 0 : index
    %c0_25 = arith.constant 0 : index
    %c0_26 = arith.constant 0 : index
    %50 = vector.load %arg8[%c0_24, %c0_25, %c0_26] : memref<4x8x128xbf16, #tpu.memory_space<vmem>>, vector<4x8x128xbf16>
    "tpu.trace_start"() <{level = 10 : i32, message = "hqd,hdo->hqo"}> : () -> ()
    %cst_27 = arith.constant dense<0.000000e+00> : vector<4x8x128xf32>
    %51 = tpu.matmul %49, %50, %cst_27 {dimension_numbers = #tpu.dot_dimension_numbers<[2], [1], [1], [2], [0, 0, 0, 1, 1, 2], [0], [0]>} : vector<4x8x8xbf16>, vector<4x8x128xbf16>, vector<4x8x128xf32> -> vector<4x8x128xf32>
    "tpu.trace_stop"() : () -> ()
    %cst_28 = arith.constant dense<0.000000e+00> : vector<8x128xf32>
    %52 = vector.multi_reduction <add>, %51, %cst_28 [0] : vector<4x8x128xf32> to vector<8x128xf32>
    %c0_29 = arith.constant 0 : index
    %c0_30 = arith.constant 0 : index
    %c0_31 = arith.constant 0 : index
    %53 = vector.load %arg9[%c0_29, %c0_30, %c0_31] : memref<2x8x128xf32, #tpu.memory_space<vmem>>, vector<1x8x128xf32>
    %54 = vector.shape_cast %53 : vector<1x8x128xf32> to vector<8x128xf32>
    %55 = vector.shape_cast %52 : vector<8x128xf32> to vector<1x8x128xf32>
    tpu.vector_store %arg9[%c0_29, %c0_30, %c0_31], %55 {strides = array<i32>} : memref<2x8x128xf32, #tpu.memory_space<vmem>>, vector<1x8x128xf32>,
    %c1_i32 = arith.constant 1 : i32
    %56 = arith.addi %0, %c1_i32 : i32
    %57 = arith.index_cast %56 : i32 to index
    %58 = memref.load %arg1[%57] : memref<2xi32, #tpu.memory_space<smem>>
    %59 = vector.broadcast %58 : i32 to vector<8x8xi32>
    %60 = arith.cmpi slt, %1, %59 : vector<8x8xi32>
    %c1 = arith.constant 1 : index
    %c0_32 = arith.constant 0 : index
    %c0_33 = arith.constant 0 : index
    %61 = vector.load %arg2[%c1, %c0_32, %c0_33] : memref<2x8x16xf32, #tpu.memory_space<vmem>>, vector<1x8x16xf32>
    %62 = vector.shape_cast %61 : vector<1x8x16xf32> to vector<8x16xf32>
    %63 = arith.truncf %62 : vector<8x16xf32> to vector<8x16xbf16>
    %c1_34 = arith.constant 1 : index
    %c0_35 = arith.constant 0 : index
    %c0_36 = arith.constant 0 : index
    %64 = vector.load %arg3[%c1_34, %c0_35, %c0_36] : memref<2x8x16xf32, #tpu.memory_space<vmem>>, vector<1x8x16xf32>
    %65 = vector.shape_cast %64 : vector<1x8x16xf32> to vector<8x16xf32>
    %66 = arith.truncf %65 : vector<8x16xf32> to vector<8x16xbf16>
    %c1_37 = arith.constant 1 : index
    %c0_38 = arith.constant 0 : index
    %c0_39 = arith.constant 0 : index
    %67 = vector.load %arg4[%c1_37, %c0_38, %c0_39] : memref<2x8x16xf32, #tpu.memory_space<vmem>>, vector<1x8x16xf32>
    %68 = vector.shape_cast %67 : vector<1x8x16xf32> to vector<8x16xf32>
    %69 = arith.truncf %68 : vector<8x16xf32> to vector<8x16xbf16>
    %70 = vector.shape_cast %63 : vector<8x16xbf16> to vector<1x8x16xbf16>
    %71 = vector.broadcast %70 : vector<1x8x16xbf16> to vector<4x8x16xbf16>
    %c0_40 = arith.constant 0 : index
    %c0_41 = arith.constant 0 : index
    %c0_42 = arith.constant 0 : index
    %72 = vector.load %arg5[%c0_40, %c0_41, %c0_42] : memref<4x16x8xbf16, #tpu.memory_space<vmem>>, vector<4x16x8xbf16>
    "tpu.trace_start"() <{level = 10 : i32, message = "hsd,hdf->hsf"}> : () -> ()
    %cst_43 = arith.constant dense<0.000000e+00> : vector<4x8x8xf32>
    %73 = tpu.matmul %71, %72, %cst_43 {dimension_numbers = #tpu.dot_dimension_numbers<[2], [1], [1], [2], [0, 0, 0, 1, 1, 2], [0], [0]>} : vector<4x8x16xbf16>, vector<4x16x8xbf16>, vector<4x8x8xf32> -> vector<4x8x8xf32>
    "tpu.trace_stop"() : () -> ()
    %74 = vector.shape_cast %66 : vector<8x16xbf16> to vector<1x8x16xbf16>
    %75 = vector.broadcast %74 : vector<1x8x16xbf16> to vector<4x8x16xbf16>
    %c0_44 = arith.constant 0 : index
    %c0_45 = arith.constant 0 : index
    %c0_46 = arith.constant 0 : index
    %76 = vector.load %arg6[%c0_44, %c0_45, %c0_46] : memref<4x16x8xbf16, #tpu.memory_space<vmem>>, vector<4x16x8xbf16>
    "tpu.trace_start"() <{level = 10 : i32, message = "hsd,hdf->hsf"}> : () -> ()
    %cst_47 = arith.constant dense<0.000000e+00> : vector<4x8x8xf32>
    %77 = tpu.matmul %75, %76, %cst_47 {dimension_numbers = #tpu.dot_dimension_numbers<[2], [1], [1], [2], [0, 0, 0, 1, 1, 2], [0], [0]>} : vector<4x8x16xbf16>, vector<4x16x8xbf16>, vector<4x8x8xf32> -> vector<4x8x8xf32>
    "tpu.trace_stop"() : () -> ()
    %78 = vector.shape_cast %69 : vector<8x16xbf16> to vector<1x8x16xbf16>
    %79 = vector.broadcast %78 : vector<1x8x16xbf16> to vector<4x8x16xbf16>
    %c0_48 = arith.constant 0 : index
    %c0_49 = arith.constant 0 : index
    %c0_50 = arith.constant 0 : index
    %80 = vector.load %arg7[%c0_48, %c0_49, %c0_50] : memref<4x16x8xbf16, #tpu.memory_space<vmem>>, vector<4x16x8xbf16>
    "tpu.trace_start"() <{level = 10 : i32, message = "hsd,hdf->hsf"}> : () -> ()
    %cst_51 = arith.constant dense<0.000000e+00> : vector<4x8x8xf32>
    %81 = tpu.matmul %79, %80, %cst_51 {dimension_numbers = #tpu.dot_dimension_numbers<[2], [1], [1], [2], [0, 0, 0, 1, 1, 2], [0], [0]>} : vector<4x8x16xbf16>, vector<4x16x8xbf16>, vector<4x8x8xf32> -> vector<4x8x8xf32>
    "tpu.trace_stop"() : () -> ()
    %82 = arith.truncf %73 : vector<4x8x8xf32> to vector<4x8x8xbf16>
    %83 = arith.truncf %77 : vector<4x8x8xf32> to vector<4x8x8xbf16>
    "tpu.trace_start"() <{level = 10 : i32, message = "hqd,hkd->hqk"}> : () -> ()
    %cst_52 = arith.constant dense<0.000000e+00> : vector<4x8x8xf32>
    %84 = tpu.matmul %82, %83, %cst_52 {dimension_numbers = #tpu.dot_dimension_numbers<[2], [2], [1], [1], [0, 0, 0, 1, 1, 1], [0], [0]>} : vector<4x8x8xbf16>, vector<4x8x8xbf16>, vector<4x8x8xf32> -> vector<4x8x8xf32>
    "tpu.trace_stop"() : () -> ()
    %85 = vector.shape_cast %60 : vector<8x8xi1> to vector<1x8x8xi1>
    %cst_53 = arith.constant -1.000000e+06 : f32
    %86 = vector.shape_cast %85 : vector<1x8x8xi1> to vector<1x8x8xi1>
    %87 = vector.broadcast %86 : vector<1x8x8xi1> to vector<4x8x8xi1>
    %88 = vector.broadcast %cst_53 : f32 to vector<4x8x8xf32>
    %89 = arith.select %87, %84, %88 : vector<4x8x8xi1>, vector<4x8x8xf32>
    %cst_54 = arith.constant dense<0xFF800000> : vector<4x8xf32>
    %90 = vector.multi_reduction <maximumf>, %89, %cst_54 [2] : vector<4x8x8xf32> to vector<4x8xf32>
    %91 = vector.shape_cast %90 : vector<4x8xf32> to vector<4x8x1xf32>
    %92 = vector.broadcast %91 : vector<4x8x1xf32> to vector<4x8x8xf32>
    %93 = arith.subf %89, %92 : vector<4x8x8xf32>
    %94 = math.exp %93 : vector<4x8x8xf32>
    %cst_55 = arith.constant dense<0.000000e+00> : vector<4x8xf32>
    %95 = vector.multi_reduction <add>, %94, %cst_55 [2] : vector<4x8x8xf32> to vector<4x8xf32>
    %96 = vector.shape_cast %95 : vector<4x8xf32> to vector<4x8x1xf32>
    %97 = arith.truncf %94 : vector<4x8x8xf32> to vector<4x8x8xbf16>
    %98 = arith.truncf %81 : vector<4x8x8xf32> to vector<4x8x8xbf16>
    "tpu.trace_start"() <{level = 10 : i32, message = "hqk,hkd->hqd"}> : () -> ()
    %cst_56 = arith.constant dense<0.000000e+00> : vector<4x8x8xf32>
    %99 = tpu.matmul %97, %98, %cst_56 {dimension_numbers = #tpu.dot_dimension_numbers<[2], [1], [1], [2], [0, 0, 0, 1, 1, 2], [0], [0]>} : vector<4x8x8xbf16>, vector<4x8x8xbf16>, vector<4x8x8xf32> -> vector<4x8x8xf32>
    "tpu.trace_stop"() : () -> ()
    %100 = tpu.reciprocal %96 {approx = true} : vector<4x8x1xf32> -> vector<4x8x1xf32>
    %101 = vector.broadcast %100 : vector<4x8x1xf32> to vector<4x8x8xf32>
    %102 = arith.mulf %99, %101 : vector<4x8x8xf32>
    %103 = arith.truncf %102 : vector<4x8x8xf32> to vector<4x8x8xbf16>
    %c0_57 = arith.constant 0 : index
    %c0_58 = arith.constant 0 : index
    %c0_59 = arith.constant 0 : index
    %104 = vector.load %arg8[%c0_57, %c0_58, %c0_59] : memref<4x8x128xbf16, #tpu.memory_space<vmem>>, vector<4x8x128xbf16>
    "tpu.trace_start"() <{level = 10 : i32, message = "hqd,hdo->hqo"}> : () -> ()
    %cst_60 = arith.constant dense<0.000000e+00> : vector<4x8x128xf32>
    %105 = tpu.matmul %103, %104, %cst_60 {dimension_numbers = #tpu.dot_dimension_numbers<[2], [1], [1], [2], [0, 0, 0, 1, 1, 2], [0], [0]>} : vector<4x8x8xbf16>, vector<4x8x128xbf16>, vector<4x8x128xf32> -> vector<4x8x128xf32>
    "tpu.trace_stop"() : () -> ()
    %cst_61 = arith.constant dense<0.000000e+00> : vector<8x128xf32>
    %106 = vector.multi_reduction <add>, %105, %cst_61 [0] : vector<4x8x128xf32> to vector<8x128xf32>
    %c1_62 = arith.constant 1 : index
    %c0_63 = arith.constant 0 : index
    %c0_64 = arith.constant 0 : index
    %107 = vector.load %arg9[%c1_62, %c0_63, %c0_64] : memref<2x8x128xf32, #tpu.memory_space<vmem>>, vector<1x8x128xf32>
    %108 = vector.shape_cast %107 : vector<1x8x128xf32> to vector<8x128xf32>
    %109 = vector.shape_cast %106 : vector<8x128xf32> to vector<1x8x128xf32>
    tpu.vector_store %arg9[%c1_62, %c0_63, %c0_64], %109 {strides = array<i32>} : memref<2x8x128xf32, #tpu.memory_space<vmem>>, vector<1x8x128xf32>,
    return
  }
  func.func @transform_0(%arg0: i32, %arg1: memref<2xi32, #tpu.memory_space<smem>>) -> (i32, i32, i32) {
    %c0_i32 = arith.constant 0 : i32
    %c0_i32_0 = arith.constant 0 : i32
    %c0_i32_1 = arith.constant 0 : i32
    return %arg0, %c0_i32, %c0_i32_0 : i32, i32, i32
  }
  func.func @transform_1(%arg0: i32, %arg1: memref<2xi32, #tpu.memory_space<smem>>) -> (i32, i32, i32) {
    %c0_i32 = arith.constant 0 : i32
    %c0_i32_0 = arith.constant 0 : i32
    %c0_i32_1 = arith.constant 0 : i32
    return %arg0, %c0_i32, %c0_i32_0 : i32, i32, i32
  }
  func.func @transform_2(%arg0: i32, %arg1: memref<2xi32, #tpu.memory_space<smem>>) -> (i32, i32, i32) {
    %c0_i32 = arith.constant 0 : i32
    %c0_i32_0 = arith.constant 0 : i32
    %c0_i32_1 = arith.constant 0 : i32
    return %arg0, %c0_i32, %c0_i32_0 : i32, i32, i32
  }
  func.func @transform_3(%arg0: i32, %arg1: memref<2xi32, #tpu.memory_space<smem>>) -> (i32, i32, i32) {
    %c0_i32 = arith.constant 0 : i32
    %c0_i32_0 = arith.constant 0 : i32
    %c0_i32_1 = arith.constant 0 : i32
    %c0_i32_2 = arith.constant 0 : i32
    return %c0_i32, %c0_i32_0, %c0_i32_1 : i32, i32, i32
  }
  func.func @transform_4(%arg0: i32, %arg1: memref<2xi32, #tpu.memory_space<smem>>) -> (i32, i32, i32) {
    %c0_i32 = arith.constant 0 : i32
    %c0_i32_0 = arith.constant 0 : i32
    %c0_i32_1 = arith.constant 0 : i32
    %c0_i32_2 = arith.constant 0 : i32
    return %c0_i32, %c0_i32_0, %c0_i32_1 : i32, i32, i32
  }
  func.func @transform_5(%arg0: i32, %arg1: memref<2xi32, #tpu.memory_space<smem>>) -> (i32, i32, i32) {
    %c0_i32 = arith.constant 0 : i32
    %c0_i32_0 = arith.constant 0 : i32
    %c0_i32_1 = arith.constant 0 : i32
    %c0_i32_2 = arith.constant 0 : i32
    return %c0_i32, %c0_i32_0, %c0_i32_1 : i32, i32, i32
  }
  func.func @transform_6(%arg0: i32, %arg1: memref<2xi32, #tpu.memory_space<smem>>) -> (i32, i32, i32) {
    %c0_i32 = arith.constant 0 : i32
    %c0_i32_0 = arith.constant 0 : i32
    %c0_i32_1 = arith.constant 0 : i32
    %c0_i32_2 = arith.constant 0 : i32
    return %c0_i32, %c0_i32_0, %c0_i32_1 : i32, i32, i32
  }
  func.func @transform_7(%arg0: i32, %arg1: memref<2xi32, #tpu.memory_space<smem>>) -> (i32, i32, i32) {
    %c0_i32 = arith.constant 0 : i32
    %c0_i32_0 = arith.constant 0 : i32
    %c0_i32_1 = arith.constant 0 : i32
    return %arg0, %c0_i32, %c0_i32_0 : i32, i32, i32
  }
}

</mosaic_0001>

<bundles_post_ra>
// kernel: tpu_custom_call.1
= control target key start
LH: loop header
LB: loop body
LE: loop exit
PB: predicated region body
PF: predicated region fallthrough
CT: control target
= control target key end

     0   :  { %s3566_s0 = inlined_call_operand.vmem [shape: s32[2], index: 0, kind: input, shape index: {}]   ;;  %s3567_s1 = inlined_call_operand.vmem [shape: f32[2,8,16], index: 1, kind: input, shape index: {}]   ;;  %s3568_s2 = inlined_call_operand.vmem [shape: f32[2,8,16], index: 2, kind: input, shape index: {}]   ;;  %s3569_s3 = inlined_call_operand.vmem [shape: f32[2,8,16], index: 3, kind: input, shape index: {}]   ;;  %s3570_s4 = inlined_call_operand.vmem [shape: bf16[4,16,8], index: 4, kind: input, shape index: {}]   ;;  %s3571_s5 = inlined_call_operand.vmem [shape: bf16[4,16,8], index: 5, kind: input, shape index: {}]   ;;  %s3572_s6 = inlined_call_operand.vmem [shape: bf16[4,16,8], index: 6, kind: input, shape index: {}]   ;;  %s3573_s7 = inlined_call_operand.vmem [shape: bf16[4,8,128], index: 7, kind: input, shape index: {}]   ;;  %s3574_s8 = inlined_call_operand.hbm [shape: f32[2,8,128], index: 8, kind: output, shape index: {}]  }
   0x1   :  { %s13_s29 = sshll.u32 %s3566_s0, 4  ;;  %s14_s29 = int_to_ptr.vmem [resolvable:$true] %s13_s29 }
   0x2   :  { %s3056_s30 = scalar_lea.vmem %s14_s29, 16  ;;  %p3061_p1 = scmp.lt.s32.totalorder %s14_s29, %s14_s29 }
   0x3   :  { %p3057_p0 = scmp.ne.s32.totalorder %s14_s29, %s3056_s30  ;;  %p3062_p2 = scmp.lt.s32.totalorder %s3056_s30, %s3056_s30 }
   0x5   :  { %p3063_p3 = por %p3062_p2, %p3061_p1 }
   0x7   :  { %p3064_p4 = pnand %p3063_p3, %p3057_p0 }
   0x9   :  { %3067 = shalt.err (!%p3064_p4)  }
   0xa   :  { %s3094_s9 = smov [#allocation3]  }
   0xb   :  { %16 = dma.vmem_to_smem %s14_s29, 16, %s3094_s9, [#allocation2] }
   0xc   :  { %3090 = dma.done.wait [#allocation2], 16 }
   0xd   :  { %3091 = vsyncadd [#allocation2], 4294967280 }
   0xe   :  { %18 = sfence }
   0xf   :  { %v3000_v0 = vld [vmem:[%s3570_s4] sm:$0xff]   ;;  %v3095_v1 = vmov 0.0   ;;  %vm3096_vm0 = vmmov 0   ;;  %vm61_vm1 = vcmask 130048   ;;  %v3002_v7 = vld [vmem:[%s3570_s4 + $0x8] sm:$0xff]   ;;  %v3003_v8 = vld [vmem:[%s3571_s5 + $0x10] sm:$0xff]  }
  0x10   :  { %2682 = vmatprep.subr.bf16.mxu1 %v3095_v1  ;;  %2706 = vmatprep.subr.bf16.mxu0 %v3095_v1  ;;  %v3001_v2 = vld [vmem:[%s3571_s5] sm:$0xff]   ;;  %v3004_v9 = vld [vmem:[%s3570_s4 + $0x10] sm:$0xff]   ;;  %v3005_v12 = vld [vmem:[%s3570_s4 + $0x18] sm:$0xff]  }
  0x11   :  { %2683 = vmatpush3.bf16.msra.mxu1 %v3000_v0  ;;  %2684 = vmatprep.mubr.msk.bf16.mxu1 %vm3096_vm0, %v3095_v1  ;;  %v41_v3 = vld [vmem:[%s3567_s1] sm:$0xff]  ;;  %v3009_v14 = vld [vmem:[%s3572_s6 + $0x10] sm:$0xff]  }
  0x12   :  { %v43_v4 = vld [vmem:[%s3568_s2] sm:$0xff]  ;;  %2707 = vmatpush3.bf16.msra.mxu0 %v3001_v2  ;;  %2708 = vmatprep.mubr.msk.bf16.mxu0 %vm3096_vm0, %v3095_v1  ;;  %v42_v5 = vpack.c.bf16 %v41_v3, %v41_v3 }
  0x13   :  { %v44_v6 = vpack.c.bf16 %v43_v4, %v43_v4  ;;  %2688 = vmatprep.subr.bf16.mxu1 %v3095_v1  ;;  %2718 = vmatprep.subr.bf16.mxu0 %v3095_v1  ;;  %v3008_v10 = vld [vmem:[%s3572_s6] sm:$0xff]  }
  0x14   :  { %2685 = vmatmul.mubr.msk.bf16.vlgmr.msra.gmra.mrb[0].mxu1 %vm61_vm1, %v42_v5  ;;  %v45_v11 = vld [vmem:[%s3569_s3] sm:$0xff] }
  0x15   :  { %2709 = vmatmul.mubr.msk.bf16.vlgmr.msra.gmra.mrb[0].mxu0 %vm61_vm1, %v44_v6  ;;  %2689 = vmatpush3.bf16.msra.mxu1 %v3002_v7  ;;  %v46_v13 = vpack.c.bf16 %v45_v11, %v45_v11 }
  0x16   :  { %2719 = vmatpush3.bf16.msra.mxu0 %v3003_v8  ;;  %2690 = vmatprep.mubr.msk.bf16.mxu1 %vm3096_vm0, %v3095_v1 }
  0x17   :  { %2720 = vmatprep.mubr.msk.bf16.mxu0 %vm3096_vm0, %v3095_v1  ;;  %2694 = vmatprep.subr.bf16.mxu1 %v3095_v1 }
  0x18   :  { %2730 = vmatprep.subr.bf16.mxu0 %v3095_v1 }
  0x1c   :  { %2691 = vmatmul.mubr.msk.bf16.vlgmr.msra.gmra.mrb[4].mxu1 %vm61_vm1, %v42_v5 }
  0x1d   :  { %2721 = vmatmul.mubr.msk.bf16.vlgmr.msra.gmra.mrb[4].mxu0 %vm61_vm1, %v44_v6  ;;  %2695 = vmatpush3.bf16.msra.mxu1 %v3004_v9 }
  0x1e   :  { %2696 = vmatprep.mubr.msk.bf16.mxu1 %vm3096_vm0, %v3095_v1  ;;  %2700 = vmatprep.subr.bf16.mxu1 %v3095_v1 }
  0x1f   :  { %2731 = vmatpush3.bf16.msra.mxu0 %v3008_v10  ;;  %2732 = vmatprep.mubr.msk.bf16.mxu0 %vm3096_vm0, %v3095_v1 }
  0x20   :  { %2742 = vmatprep.subr.bf16.mxu0 %v3095_v1 }
  0x21   :  { %19 = vsyncpa [#allocation5], 0  ;;  %v3006_v15 = vld [vmem:[%s3571_s5 + $0x8] sm:$0xff]   ;;  %v3007_v16 = vld [vmem:[%s3571_s5 + $0x18] sm:$0xff]   ;;  %vm641_vm2 = vcmask 64512   ;;  %vm879_vm3 = vcmask 1043456  }
  0x22   :  { %v3010_v17 = vld [vmem:[%s3572_s6 + $0x8] sm:$0xff]   ;;  %v3011_v18 = vld [vmem:[%s3572_s6 + $0x18] sm:$0xff]   ;;  %s38_s16 = sld [smem:[#allocation3]] }
  0x24   :  { %2697 = vmatmul.mubr.msk.bf16.vlgmr.msra.gmra.mrb[8].mxu1 %vm61_vm1, %v42_v5 }
  0x25   :  { %2701 = vmatpush3.bf16.msra.mxu1 %v3005_v12  ;;  %2702 = vmatprep.mubr.msk.bf16.mxu1 %vm3096_vm0, %v3095_v1 }
  0x26   :  { %2712 = vmatprep.subr.bf16.mxu1 %v3095_v1  ;;  %2733 = vmatmul.mubr.msk.bf16.vlgmr.msra.gmra.mrb[8].mxu0 %vm61_vm1, %v46_v13 }
  0x27   :  { %2743 = vmatpush3.bf16.msra.mxu0 %v3009_v14  ;;  %2744 = vmatprep.mubr.msk.bf16.mxu0 %vm3096_vm0, %v3095_v1 }
  0x28   :  { %2754 = vmatprep.subr.bf16.mxu0 %v3095_v1 }
  0x2c   :  { %2703 = vmatmul.mubr.msk.bf16.vlgmr.msra.gmra.mrb[12].mxu1 %vm61_vm1, %v42_v5 }
  0x2d   :  { %2713 = vmatpush3.bf16.msra.mxu1 %v3006_v15  ;;  %2714 = vmatprep.mubr.msk.bf16.mxu1 %vm3096_vm0, %v3095_v1 }
  0x2e   :  { %2724 = vmatprep.subr.bf16.mxu1 %v3095_v1  ;;  %2745 = vmatmul.mubr.msk.bf16.vlgmr.msra.gmra.mrb[12].mxu0 %vm61_vm1, %v46_v13 }
  0x2f   :  { %2756 = vmatprep.mubr.msk.bf16.mxu0 %vm3096_vm0, %v3095_v1 }
  0x34   :  { %2715 = vmatmul.mubr.msk.bf16.vlgmr.msra.gmra.mrb[16].mxu1 %vm61_vm1, %v44_v6 }
  0x35   :  { %2725 = vmatpush3.bf16.msra.mxu1 %v3007_v16  ;;  %2726 = vmatprep.mubr.msk.bf16.mxu1 %vm3096_vm0, %v3095_v1 }
  0x36   :  { %2736 = vmatprep.subr.bf16.mxu1 %v3095_v1 }
  0x3c   :  { %2727 = vmatmul.mubr.msk.bf16.vlgmr.msra.gmra.mrb[20].mxu1 %vm61_vm1, %v44_v6 }
  0x3d   :  { %2738 = vmatprep.mubr.msk.bf16.mxu1 %vm3096_vm0, %v3095_v1  ;;  %2737 = vmatpush3.bf16.msra.mxu1 %v3010_v17 }
  0x3e   :  { %2748 = vmatprep.subr.bf16.mxu1 %v3095_v1 }
  0x44   :  { %2739 = vmatmul.mubr.msk.bf16.vlgmr.msra.gmra.mrb[24].mxu1 %vm61_vm1, %v46_v13 }
  0x45   :  { %2750 = vmatprep.mubr.msk.bf16.mxu1 %vm3096_vm0, %v3095_v1  ;;  %2749 = vmatpush3.bf16.msra.mxu1 %v3011_v18 }
  0x46   :  { %2760 = vmatprep.subr.bf16.mxu1 %v3095_v1 }
  0x4c   :  { %2751 = vmatmul.mubr.msk.bf16.vlgmr.msra.gmra.mrb[28].mxu1 %vm61_vm1, %v46_v13 }
  0x4d   :  { %2762 = vmatprep.mubr.msk.bf16.mxu1 %vm3096_vm0, %v3095_v1 }
  0xe7   :  { %v99_v19 = vpop.f32.mrb[0].mxu1 }
  0xe8   :  { %v294_v20 = vpop.f32.mrb[0].mxu0  ;;  %v2686_v21 = vpop.f32.mrb[1].mxu1  ;;  %v633_v32 = vpack.c.bf16 %v99_v19, %v99_v19 }
  0xe9   :  { %v637_v22 = vpack.c.bf16 %v294_v20, %v294_v20  ;;  %v102_v23 = vpop.f32.mrb[2].mxu1  ;;  %v2710_v24 = vpop.f32.mrb[1].mxu0  ;;  %v36_v20 = vlaneseq }
  0xea   :  { %v2687_v25 = vpop.f32.mrb[3].mxu1  ;;  %v297_v26 = vpop.f32.mrb[2].mxu0  ;;  %v3017_v23 = vld [vmem:[%s3571_s5 + $0x18] sm:$0xff]  }
  0xeb   :  { %v646_v27 = vsel %vm641_vm2, %v637_v22, 0  ;;  %v2711_v28 = vpop.f32.mrb[3].mxu0  ;;  %v3275_v21 = vand.u32 127, %v36_v20  ;;  %v39_v22 = vstv %s38_s16  ;;  %v2548_v20 = vld [vmem:[%s3568_s2 + $0x8] sm:$0xff]  ;;  %s3097_s2 = smov [#allocation4]  }
  0xec   :  { %2755 = vmatpush3.bf16.xpose.msra.mxu0 %v646_v27  ;;  %s2499_s11 = sshll.u32 %s3097_s2, 4  ;;  %s2500_s11 = int_to_ptr.vmem [resolvable:$true] %s2499_s11 }
  0xed   :  { %2766 = vmatprep.subr.bf16.mxu0 %v3095_v1  ;;  %vm3278_vm4 = vcmp.lt.s32.totalorder %v3275_v21, %v39_v22  ;;  %v3356_v22 = vpack.c.bf16 %v2548_v20, %v2548_v20  ;;  %p3073_p6 = scmp.lt.s32.totalorder %s2500_s11, %s2500_s11 }
  0xef   :  { %v145_v29 = vpop.f32.mrb[4].mxu1 }
  0xf0   :  { %v386_v30 = vpop.f32.mrb[4].mxu0  ;;  %v2692_v31 = vpop.f32.mrb[5].mxu1  ;;  %v634_v3 = vpack.c.bf16 %v145_v29, %v145_v29 }
  0xf1   :  { %v639_v33 = vpack.c.bf16 %v386_v30, %v386_v30  ;;  %v148_v34 = vpop.f32.mrb[6].mxu1  ;;  %v2722_v35 = vpop.f32.mrb[5].mxu0 }
  0xf2   :  { %v2693_v36 = vpop.f32.mrb[7].mxu1  ;;  %v389_v37 = vpop.f32.mrb[6].mxu0 }
  0xf3   :  { %v738_v38 = vsel %vm641_vm2, %v639_v33, 0  ;;  %2757 = vmatmul.mubr.msk.bf16.vlgmr.msra.gmra.mrb[16].mxu0 %vm641_vm2, %v633_v32  ;;  %v2723_v39 = vpop.f32.mrb[7].mxu0 }
  0xf4   :  { %2767 = vmatpush3.bf16.xpose.msra.mxu0 %v738_v38  ;;  %2768 = vmatprep.mubr.msk.bf16.mxu0 %vm3096_vm0, %v3095_v1 }
  0xf5   :  { %2778 = vmatprep.subr.bf16.mxu0 %v3095_v1 }
  0xf7   :  { %v191_v40 = vpop.f32.mrb[8].mxu1 }
  0xf8   :  { %v635_v41 = vpack.c.bf16 %v191_v40, %v191_v40  ;;  %v2698_v42 = vpop.f32.mrb[9].mxu1 }
  0xf9   :  { %v194_v43 = vpop.f32.mrb[10].mxu1  ;;  %v489_v44 = vpop.f32.mrb[8].mxu0 }
  0xfa   :  { %v2699_v45 = vpop.f32.mrb[11].mxu1  ;;  %v872_v46 = vpack.c.bf16 %v489_v44, %v489_v44  ;;  %v2734_v47 = vpop.f32.mrb[9].mxu0 }
  0xfb   :  { %2769 = vmatmul.mubr.msk.bf16.vlgmr.msra.gmra.mrb[20].mxu0 %vm641_vm2, %v635_v41  ;;  %v492_v48 = vpop.f32.mrb[10].mxu0 }
  0xfc   :  { %v881_v49 = vsel %vm879_vm3, %v872_v46, 0  ;;  %v2735_v50 = vpop.f32.mrb[11].mxu0  ;;  %2780 = vmatprep.mubr.msk.bf16.mxu0 %vm3096_vm0, %v3095_v1 }
  0xfd   :  { %2779 = vmatpush3.bf16.msra.mxu0 %v881_v49 }
  0xfe   :  { %2790 = vmatprep.subr.bf16.mxu0 %v3095_v1 }
  0xff   :  { %v237_v51 = vpop.f32.mrb[12].mxu1 }
 0x100   :  { %v2704_v52 = vpop.f32.mrb[13].mxu1  ;;  %v636_v9 = vpack.c.bf16 %v237_v51, %v237_v51 }
 0x101   :  { %v240_v53 = vpop.f32.mrb[14].mxu1  ;;  %v3259_v54 = vpop.f32.mrb[12].mxu0 }
 0x102   :  { %v2705_v55 = vpop.f32.mrb[15].mxu1  ;;  %v2746_v56 = vpop.f32.mrb[13].mxu0 }
 0x103   :  { %v584_v57 = vpop.f32.mrb[14].mxu0  ;;  %v874_v55 = vpack.c.bf16 %v3259_v54, %v3259_v54 }
 0x104   :  { %v2747_v58 = vpop.f32.mrb[15].mxu0 }
 0x107   :  { %v340_v59 = vpop.f32.mrb[16].mxu1 }
 0x108   :  { %v638_v60 = vpack.c.bf16 %v340_v59, %v340_v59  ;;  %v2716_v61 = vpop.f32.mrb[17].mxu1  ;;  %v973_v59 = vsel %vm879_vm3, %v874_v55, 0 }
 0x109   :  { %v343_v62 = vpop.f32.mrb[18].mxu1 }
 0x10a   :  { %v692_v63 = vsel %vm641_vm2, %v638_v60, 0  ;;  %v2717_v0 = vpop.f32.mrb[19].mxu1 }
 0x10b   :  { %2761 = vmatpush3.bf16.xpose.msra.mxu1 %v692_v63 }
 0x10c   :  { %2772 = vmatprep.subr.bf16.mxu1 %v3095_v1 }
 0x10f   :  { %v432_v2 = vpop.f32.mrb[20].mxu1 }
 0x110   :  { %v640_v4 = vpack.c.bf16 %v432_v2, %v432_v2  ;;  %v2728_v5 = vpop.f32.mrb[21].mxu1 }
 0x111   :  { %v435_v6 = vpop.f32.mrb[22].mxu1 }
 0x112   :  { %v784_v7 = vsel %vm641_vm2, %v640_v4, 0  ;;  %2763 = vmatmul.mubr.msk.bf16.vlgmr.msra.gmra.mrb[32].mxu1 %vm641_vm2, %v634_v3  ;;  %v2729_v8 = vpop.f32.mrb[23].mxu1 }
 0x113   :  { %2773 = vmatpush3.bf16.xpose.msra.mxu1 %v784_v7  ;;  %2774 = vmatprep.mubr.msk.bf16.mxu1 %vm3096_vm0, %v3095_v1 }
 0x114   :  { %2784 = vmatprep.subr.bf16.mxu1 %v3095_v1 }
 0x117   :  { %v535_v10 = vpop.f32.mrb[24].mxu1 }
 0x118   :  { %v873_v11 = vpack.c.bf16 %v535_v10, %v535_v10  ;;  %v2740_v12 = vpop.f32.mrb[25].mxu1 }
 0x119   :  { %v538_v13 = vpop.f32.mrb[26].mxu1 }
 0x11a   :  { %2775 = vmatmul.mubr.msk.bf16.vlgmr.msra.gmra.mrb[36].mxu1 %vm641_vm2, %v636_v9  ;;  %v927_v14 = vsel %vm879_vm3, %v873_v11, 0  ;;  %v2741_v15 = vpop.f32.mrb[27].mxu1  ;;  %v3012_v11 = vld [vmem:[%s3570_s4] sm:$0xff]  }
 0x11b   :  { %2786 = vmatprep.mubr.msk.bf16.mxu1 %vm3096_vm0, %v3095_v1  ;;  %2785 = vmatpush3.bf16.msra.mxu1 %v927_v14  ;;  %v2547_v14 = vld [vmem:[%s3567_s1 + $0x8] sm:$0xff] }
 0x11c   :  { %2796 = vmatprep.subr.bf16.mxu1 %v3095_v1  ;;  %v1271_v15 = vpack.c.bf16 %v2547_v14, %v2547_v14 }
 0x11f   :  { %v3273_v16 = vpop.f32.mrb[28].mxu1 }
 0x120   :  { %v2752_v17 = vpop.f32.mrb[29].mxu1  ;;  %v875_v5 = vpack.c.bf16 %v3273_v16, %v3273_v16  ;;  %v3013_v16 = vld [vmem:[%s3570_s4 + $0x8] sm:$0xff]  }
 0x121   :  { %v630_v18 = vpop.f32.mrb[30].mxu1  ;;  %v3014_v17 = vld [vmem:[%s3570_s4 + $0x10] sm:$0xff]  }
 0x122   :  { %v2753_v19 = vpop.f32.mrb[31].mxu1  ;;  %v1019_v9 = vsel %vm879_vm3, %v875_v5, 0  ;;  %v3015_v18 = vld [vmem:[%s3570_s4 + $0x18] sm:$0xff]  }
 0x123   :  { %v3016_v19 = vld [vmem:[%s3571_s5 + $0x8] sm:$0xff]  }
 0x1c6   :  { %v682_v24 = vpop.f32.mrb[16].mxu0 }
 0x1c7   :  { %v828_v25 = vsel %vm3278_vm4, %v682_v24, -1000000.0  ;;  %v2758_v26 = vpop.f32.mrb[17].mxu0  ;;  %v1073_v24 = vld [vmem:[%s3573_s7] sm:$0xf] }
 0x1c8   :  { %v685_v27 = vpop.f32.mrb[18].mxu0  ;;  %v832_v28 = vsel %vm641_vm2, %v828_v25, -inf  ;;  %v3019_v26 = vld [vmem:[%s3572_s6 + $0x8] sm:$0xff]  }
 0x1c9   :  { %v2759_v29 = vpop.f32.mrb[19].mxu0  ;;  %833 = vmax.xlane.f32.xlu0 %v832_v28  ;;  %v2549_v27 = vld [vmem:[%s3569_s3 + $0x8] sm:$0xff] }
 0x1ca   :  { %v3381_v28 = vpack.c.bf16 %v2549_v27, %v2549_v27  ;;  %v3021_v29 = vld [vmem:[%s3572_s6 + $0x18] sm:$0xff]  }
 0x1ce   :  { %v774_v30 = vpop.f32.mrb[20].mxu0 }
 0x1cf   :  { %v830_v31 = vsel %vm3278_vm4, %v774_v30, -1000000.0  ;;  %v2770_v32 = vpop.f32.mrb[21].mxu0 }
 0x1d0   :  { %v777_v33 = vpop.f32.mrb[22].mxu0  ;;  %v838_v34 = vsel %vm641_vm2, %v830_v31, -inf }
 0x1d1   :  { %v2771_v35 = vpop.f32.mrb[23].mxu0  ;;  %839 = vmax.xlane.f32.xlu1 %v838_v34  ;;  %v1074_v33 = vld [vmem:[%s3573_s7 + $0x4] sm:$0xf] }
 0x1e5   :  { %v728_v36 = vpop.f32.mrb[32].mxu1 }
 0x1e6   :  { %v829_v37 = vsel %vm3278_vm4, %v728_v36, -1000000.0  ;;  %v2764_v38 = vpop.f32.mrb[33].mxu1 }
 0x1e7   :  { %v731_v39 = vpop.f32.mrb[34].mxu1  ;;  %v835_v40 = vsel %vm641_vm2, %v829_v37, -inf }
 0x1e8   :  { %v2765_v41 = vpop.f32.mrb[35].mxu1  ;;  %836 = vmax.xlane.f32.xlu0 %v835_v40  ;;  %v1127_v39 = vsel %vm879_vm3, %v1074_v33, 0 }
 0x1ed   :  { %v820_v42 = vpop.f32.mrb[36].mxu1 }
 0x1ee   :  { %v831_v43 = vsel %vm3278_vm4, %v820_v42, -1000000.0  ;;  %v2776_v44 = vpop.f32.mrb[37].mxu1 }
 0x1ef   :  { %v823_v45 = vpop.f32.mrb[38].mxu1  ;;  %v841_v46 = vsel %vm641_vm2, %v831_v43, -inf }
 0x1f0   :  { %v2777_v47 = vpop.f32.mrb[39].mxu1  ;;  %842 = vmax.xlane.f32.xlu1 %v841_v46 }
 0x256   :  { %v834_v48 = vpop.xlane.xlu0 %833 }
 0x257   :  { %v844_v49 = vsub.f32 %v828_v25, %v834_v48  ;;  %v1081_v25 = vsel %vm879_vm3, %v1073_v24, 0  ;;  %v1075_v48 = vld [vmem:[%s3573_s7 + $0x8] sm:$0xf]  ;;  %v3022_v24 = vld [vmem:[%s3572_s6] sm:$0xff]  }
 0x258   :  { %v1173_v55 = vsel %vm879_vm3, %v1075_v48, 0 }
 0x259   :  { %v848_v50 = vmul.f32 1.442695, %v844_v49 }
 0x25b   :  { %3024 = vpow2.f32 %v848_v50 }
 0x25e   :  { %v840_v51 = vpop.xlane.xlu1 %839 }
 0x25f   :  { %v846_v52 = vsub.f32 %v830_v31, %v840_v51 }
 0x261   :  { %v852_v53 = vmul.f32 1.442695, %v846_v52 }
 0x263   :  { %3026 = vpow2.f32 %v852_v53 }
 0x265   :  { %v3025_v56 = vpop.eup %3024 }
 0x266   :  { %v856_v57 = vsel %vm641_vm2, %v3025_v56, 0.0  ;;  %v868_v58 = vpack.c.bf16 %v3025_v56, %v3025_v56 }
 0x267   :  { %857 = vadd.xlane.f32.xlu0 %v856_v57 }
 0x268   :  { %2781 = vmatmul.mubr.msk.bf16.vlgmr.msra.gmra.mrb[24].mxu0 %vm641_vm2, %v868_v58 }
 0x269   :  { %2791 = vmatpush3.bf16.msra.mxu0 %v973_v59  ;;  %2792 = vmatprep.mubr.msk.bf16.mxu0 %vm3096_vm0, %v3095_v1 }
 0x26a   :  { %2802 = vmatprep.subr.bf16.mxu0 %v3095_v1 }
 0x26d   :  { %v3027_v60 = vpop.eup %3026 }
 0x26e   :  { %v862_v61 = vsel %vm641_vm2, %v3027_v60, 0.0  ;;  %v870_v62 = vpack.c.bf16 %v3027_v60, %v3027_v60 }
 0x26f   :  { %863 = vadd.xlane.f32.xlu0 %v862_v61 }
 0x270   :  { %2793 = vmatmul.mubr.msk.bf16.vlgmr.msra.gmra.mrb[28].mxu0 %vm641_vm2, %v870_v62 }
 0x271   :  { %2804 = vmatprep.mubr.msk.bf16.mxu0 %vm3096_vm0, %v3095_v1  ;;  %2803 = vmatpush3.bf16.msra.mxu0 %v1081_v25 }
 0x272   :  { %2808 = vmatprep.subr.bf16.mxu0 %v3095_v1 }
 0x275   :  { %v837_v54 = vpop.xlane.xlu0 %836 }
 0x276   :  { %v845_v63 = vsub.f32 %v829_v37, %v837_v54  ;;  %v1076_v54 = vld [vmem:[%s3573_s7 + $0xc] sm:$0xf] }
 0x278   :  { %v850_v0 = vmul.f32 1.442695, %v845_v63 }
 0x27a   :  { %3028 = vpow2.f32 %v850_v0  ;;  %v1219_v0 = vsel %vm879_vm3, %v1076_v54, 0 }
 0x27d   :  { %v843_v2 = vpop.xlane.xlu1 %842 }
 0x27e   :  { %v847_v3 = vsub.f32 %v831_v43, %v843_v2 }
 0x280   :  { %v854_v4 = vmul.f32 1.442695, %v847_v3 }
 0x282   :  { %3030 = vpow2.f32 %v854_v4 }
 0x284   :  { %v3029_v6 = vpop.eup %3028 }
 0x285   :  { %v859_v7 = vsel %vm641_vm2, %v3029_v6, 0.0  ;;  %v869_v8 = vpack.c.bf16 %v3029_v6, %v3029_v6 }
 0x286   :  { %860 = vadd.xlane.f32.xlu1 %v859_v7 }
 0x287   :  { %2787 = vmatmul.mubr.msk.bf16.vlgmr.msra.gmra.mrb[40].mxu1 %vm641_vm2, %v869_v8 }
 0x288   :  { %2797 = vmatpush3.bf16.msra.mxu1 %v1019_v9  ;;  %2798 = vmatprep.mubr.msk.bf16.mxu1 %vm3096_vm0, %v3095_v1 }
 0x289   :  { %2826 = vmatprep.subr.bf16.mxu1 %v3095_v1 }
 0x28c   :  { %v3031_v10 = vpop.eup %3030 }
 0x28d   :  { %v865_v12 = vsel %vm641_vm2, %v3031_v10, 0.0  ;;  %v871_v13 = vpack.c.bf16 %v3031_v10, %v3031_v10  ;;  %v3018_v10 = vld [vmem:[%s3571_s5] sm:$0xff]  }
 0x28e   :  { %866 = vadd.xlane.f32.xlu1 %v865_v12 }
 0x28f   :  { %2799 = vmatmul.mubr.msk.bf16.vlgmr.msra.gmra.mrb[44].mxu1 %vm641_vm2, %v871_v13 }
 0x290   :  { %2827 = vmatpush3.bf16.msra.mxu1 %v3012_v11  ;;  %2828 = vmatprep.mubr.msk.bf16.mxu1 %vm3096_vm0, %v3095_v1 }
 0x291   :  { %2832 = vmatprep.subr.bf16.mxu1 %v3095_v1 }
 0x297   :  { %2829 = vmatmul.mubr.msk.bf16.vlgmr.msra.gmra.mrb[48].mxu1 %vm61_vm1, %v1271_v15 }
 0x298   :  { %2833 = vmatpush3.bf16.msra.mxu1 %v3013_v16  ;;  %2834 = vmatprep.mubr.msk.bf16.mxu1 %vm3096_vm0, %v3095_v1 }
 0x299   :  { %2838 = vmatprep.subr.bf16.mxu1 %v3095_v1 }
 0x29f   :  { %2835 = vmatmul.mubr.msk.bf16.vlgmr.msra.gmra.mrb[52].mxu1 %vm61_vm1, %v1271_v15 }
 0x2a0   :  { %2839 = vmatpush3.bf16.msra.mxu1 %v3014_v17  ;;  %2840 = vmatprep.mubr.msk.bf16.mxu1 %vm3096_vm0, %v3095_v1  ;;  %v3020_v17 = vld [vmem:[%s3571_s5 + $0x10] sm:$0xff]  }
 0x2a1   :  { %2844 = vmatprep.subr.bf16.mxu1 %v3095_v1 }
 0x2a7   :  { %2841 = vmatmul.mubr.msk.bf16.vlgmr.msra.gmra.mrb[56].mxu1 %vm61_vm1, %v1271_v15 }
 0x2a8   :  { %2845 = vmatpush3.bf16.msra.mxu1 %v3015_v18  ;;  %2846 = vmatprep.mubr.msk.bf16.mxu1 %vm3096_vm0, %v3095_v1 }
 0x2a9   :  { %2856 = vmatprep.subr.bf16.mxu1 %v3095_v1 }
 0x2af   :  { %2847 = vmatmul.mubr.msk.bf16.vlgmr.msra.gmra.mrb[60].mxu1 %vm61_vm1, %v1271_v15 }
 0x2b0   :  { %2857 = vmatpush3.bf16.msra.mxu1 %v3016_v19  ;;  %2858 = vmatprep.mubr.msk.bf16.mxu1 %vm3096_vm0, %v3095_v1 }
 0x2b1   :  { %2868 = vmatprep.subr.bf16.mxu1 %v3095_v1 }
 0x2b7   :  { %2859 = vmatmul.mubr.msk.bf16.vlgmr.msra.gmra.mrb[64].mxu1 %vm61_vm1, %v3356_v22 }
 0x2b8   :  { %2869 = vmatpush3.bf16.msra.mxu1 %v3017_v23  ;;  %2870 = vmatprep.mubr.msk.bf16.mxu1 %vm3096_vm0, %v3095_v1 }
 0x2b9   :  { %2880 = vmatprep.subr.bf16.mxu1 %v3095_v1 }
 0x2bf   :  { %2871 = vmatmul.mubr.msk.bf16.vlgmr.msra.gmra.mrb[68].mxu1 %vm61_vm1, %v3356_v22 }
 0x2c0   :  { %2882 = vmatprep.mubr.msk.bf16.mxu1 %vm3096_vm0, %v3095_v1  ;;  %2881 = vmatpush3.bf16.msra.mxu1 %v3019_v26 }
 0x2c1   :  { %2892 = vmatprep.subr.bf16.mxu1 %v3095_v1 }
 0x2c7   :  { %2883 = vmatmul.mubr.msk.bf16.vlgmr.msra.gmra.mrb[72].mxu1 %vm61_vm1, %v3381_v28 }
 0x2c8   :  { %2893 = vmatpush3.bf16.msra.mxu1 %v3021_v29  ;;  %2894 = vmatprep.mubr.msk.bf16.mxu1 %vm3096_vm0, %v3095_v1 }
 0x2c9   :  { %2904 = vmatprep.subr.bf16.mxu1 %v3095_v1 }
 0x2cf   :  { %2895 = vmatmul.mubr.msk.bf16.vlgmr.msra.gmra.mrb[76].mxu1 %vm61_vm1, %v3381_v28 }
 0x2d0   :  { %2906 = vmatprep.mubr.msk.bf16.mxu1 %vm3096_vm0, %v3095_v1 }
 0x2f4   :  { %v858_v30 = vpop.xlane.xlu0 %857 }
 0x2f5   :  { %3032 = vrcp.f32 %v858_v30 }
 0x2fc   :  { %v864_v45 = vpop.xlane.xlu0 %863 }
 0x2ff   :  { %v3033_v31 = vpop.eup %3032 }
 0x313   :  { %v861_v44 = vpop.xlane.xlu1 %860 }
 0x314   :  { %3034 = vrcp.f32 %v861_v44 }
 0x315   :  { %3036 = vrcp.f32 %v864_v45 }
 0x31b   :  { %v867_v57 = vpop.xlane.xlu1 %866 }
 0x31c   :  { %3038 = vrcp.f32 %v867_v57 }
 0x31e   :  { %v3035_v46 = vpop.eup %3034 }
 0x31f   :  { %v3037_v59 = vpop.eup %3036 }
 0x326   :  { %v3039_v6 = vpop.eup %3038 }
 0x33b   :  { %v917_v32 = vpop.f32.mrb[24].mxu0 }
 0x33c   :  { %v1065_v34 = vmul.f32 %v3033_v31, %v917_v32  ;;  %v2782_v35 = vpop.f32.mrb[25].mxu0 }
 0x33d   :  { %v920_v36 = vpop.f32.mrb[26].mxu0 }
 0x33e   :  { %v1069_v37 = vpack.c.bf16 %v1065_v34, %v1065_v34  ;;  %v2783_v38 = vpop.f32.mrb[27].mxu0 }
 0x340   :  { %2805 = vmatmul.mubr.msk.bf16.vlgmr.msra.gmra.mrb[32].mxu0 %vm641_vm2, %v1069_v37 }
 0x341   :  { %2809 = vmatpush3.bf16.msra.mxu0 %v1127_v39  ;;  %2810 = vmatprep.mubr.msk.bf16.mxu0 %vm3096_vm0, %v3095_v1 }
 0x342   :  { %2814 = vmatprep.subr.bf16.mxu0 %v3095_v1 }
 0x343   :  { %v1009_v40 = vpop.f32.mrb[28].mxu0 }
 0x344   :  { %v2794_v41 = vpop.f32.mrb[29].mxu0  ;;  %v1067_v61 = vmul.f32 %v3037_v59, %v1009_v40  ;;  %v3023_v40 = vld [vmem:[%s3572_s6 + $0x10] sm:$0xff]   ;;  %s2546_s6 = sld [smem:[#allocation3 + $0x1]] }
 0x345   :  { %v1012_v42 = vpop.f32.mrb[30].mxu0 }
 0x346   :  { %v2795_v43 = vpop.f32.mrb[31].mxu0  ;;  %v1071_v63 = vpack.c.bf16 %v1067_v61, %v1067_v61 }
 0x35a   :  { %v963_v47 = vpop.f32.mrb[40].mxu1 }
 0x35b   :  { %v1066_v49 = vmul.f32 %v3035_v46, %v963_v47  ;;  %v2788_v50 = vpop.f32.mrb[41].mxu1 }
 0x35c   :  { %v966_v51 = vpop.f32.mrb[42].mxu1 }
 0x35d   :  { %v1070_v52 = vpack.c.bf16 %v1066_v49, %v1066_v49  ;;  %v2789_v53 = vpop.f32.mrb[43].mxu1 }
 0x35f   :  { %2811 = vmatmul.mubr.msk.bf16.vlgmr.msra.gmra.mrb[32].mxu0 %vm641_vm2, %v1070_v52 }
 0x360   :  { %2815 = vmatpush3.bf16.msra.mxu0 %v1173_v55  ;;  %2816 = vmatprep.mubr.msk.bf16.mxu0 %vm3096_vm0, %v3095_v1 }
 0x361   :  { %2820 = vmatprep.subr.bf16.mxu0 %v3095_v1 }
 0x362   :  { %v1055_v56 = vpop.f32.mrb[44].mxu1 }
 0x363   :  { %v2800_v58 = vpop.f32.mrb[45].mxu1  ;;  %v1068_v7 = vmul.f32 %v3039_v6, %v1055_v56  ;;  %v1267_v6 = vstv %s2546_s6 }
 0x364   :  { %v1058_v60 = vpop.f32.mrb[46].mxu1  ;;  %vm3486_vm5 = vcmp.lt.s32.totalorder %v3275_v21, %v1267_v6 }
 0x365   :  { %v2801_v62 = vpop.f32.mrb[47].mxu1  ;;  %v1072_v12 = vpack.c.bf16 %v1068_v7, %v1068_v7 }
 0x36a   :  { %v3416_v2 = vpop.f32.mrb[48].mxu1 }
 0x36b   :  { %2817 = vmatmul.mubr.msk.bf16.vlgmr.msra.gmra.mrb[32].mxu0 %vm641_vm2, %v1071_v63  ;;  %v2830_v3 = vpop.f32.mrb[49].mxu1  ;;  %v1863_v62 = vpack.c.bf16 %v3416_v2, %v3416_v2 }
 0x36c   :  { %2821 = vmatpush3.bf16.msra.mxu0 %v1219_v0  ;;  %2822 = vmatprep.mubr.msk.bf16.mxu0 %vm3096_vm0, %v3095_v1  ;;  %v1332_v4 = vpop.f32.mrb[50].mxu1 }
 0x36d   :  { %2850 = vmatprep.subr.bf16.mxu0 %v3095_v1  ;;  %v2831_v5 = vpop.f32.mrb[51].mxu1 }
 0x372   :  { %v1375_v8 = vpop.f32.mrb[52].mxu1 }
 0x373   :  { %v2836_v9 = vpop.f32.mrb[53].mxu1 }
 0x374   :  { %v1378_v11 = vpop.f32.mrb[54].mxu1 }
 0x375   :  { %v2837_v13 = vpop.f32.mrb[55].mxu1 }
 0x377   :  { %2823 = vmatmul.mubr.msk.bf16.vlgmr.msra.gmra.mrb[32].mxu0 %vm641_vm2, %v1072_v12 }
 0x378   :  { %2851 = vmatpush3.bf16.msra.mxu0 %v3018_v10  ;;  %2852 = vmatprep.mubr.msk.bf16.mxu0 %vm3096_vm0, %v3095_v1 }
 0x379   :  { %2862 = vmatprep.subr.bf16.mxu0 %v3095_v1 }
 0x37a   :  { %v3429_v14 = vpop.f32.mrb[56].mxu1 }
 0x37b   :  { %v2842_v15 = vpop.f32.mrb[57].mxu1  ;;  %v1865_v5 = vpack.c.bf16 %v3429_v14, %v3429_v14 }
 0x37c   :  { %v1424_v16 = vpop.f32.mrb[58].mxu1 }
 0x37d   :  { %v2843_v18 = vpop.f32.mrb[59].mxu1 }
 0x37f   :  { %2853 = vmatmul.mubr.msk.bf16.vlgmr.msra.gmra.mrb[36].mxu0 %vm61_vm1, %v3356_v22 }
 0x380   :  { %2863 = vmatpush3.bf16.msra.mxu0 %v3020_v17  ;;  %2864 = vmatprep.mubr.msk.bf16.mxu0 %vm3096_vm0, %v3095_v1 }
 0x381   :  { %2874 = vmatprep.subr.bf16.mxu0 %v3095_v1 }
 0x382   :  { %v1467_v19 = vpop.f32.mrb[60].mxu1 }
 0x383   :  { %v2848_v20 = vpop.f32.mrb[61].mxu1  ;;  %v1866_v39 = vpack.c.bf16 %v1467_v19, %v1467_v19 }
 0x384   :  { %v1470_v23 = vpop.f32.mrb[62].mxu1 }
 0x385   :  { %v2849_v25 = vpop.f32.mrb[63].mxu1 }
 0x387   :  { %2865 = vmatmul.mubr.msk.bf16.vlgmr.msra.gmra.mrb[40].mxu0 %vm61_vm1, %v3356_v22  ;;  %v1864_v22 = vpack.c.bf16 %v1375_v8, %v1375_v8 }
 0x388   :  { %2875 = vmatpush3.bf16.msra.mxu0 %v3022_v24  ;;  %2876 = vmatprep.mubr.msk.bf16.mxu0 %vm3096_vm0, %v3095_v1 }
 0x389   :  { %2886 = vmatprep.subr.bf16.mxu0 %v3095_v1 }
 0x38a   :  { %v1570_v26 = vpop.f32.mrb[64].mxu1 }
 0x38b   :  { %v1868_v27 = vpack.c.bf16 %v1570_v26, %v1570_v26  ;;  %v2860_v29 = vpop.f32.mrb[65].mxu1 }
 0x38c   :  { %v1573_v30 = vpop.f32.mrb[66].mxu1 }
 0x38d   :  { %v1921_v31 = vsel %vm641_vm2, %v1868_v27, 0  ;;  %v2861_v32 = vpop.f32.mrb[67].mxu1 }
 0x38e   :  { %2905 = vmatpush3.bf16.xpose.msra.mxu1 %v1921_v31 }
 0x38f   :  { %2916 = vmatprep.subr.bf16.mxu1 %v3095_v1  ;;  %2877 = vmatmul.mubr.msk.bf16.vlgmr.msra.gmra.mrb[44].mxu0 %vm61_vm1, %v3381_v28 }
 0x390   :  { %2888 = vmatprep.mubr.msk.bf16.mxu0 %vm3096_vm0, %v3095_v1  ;;  %2887 = vmatpush3.bf16.msra.mxu0 %v3023_v40 }
 0x391   :  { %2898 = vmatprep.subr.bf16.mxu0 %v3095_v1 }
 0x392   :  { %v1662_v33 = vpop.f32.mrb[68].mxu1 }
 0x393   :  { %v1870_v34 = vpack.c.bf16 %v1662_v33, %v1662_v33  ;;  %v2872_v35 = vpop.f32.mrb[69].mxu1 }
 0x394   :  { %v1665_v36 = vpop.f32.mrb[70].mxu1 }
 0x395   :  { %v2013_v37 = vsel %vm641_vm2, %v1870_v34, 0  ;;  %2907 = vmatmul.mubr.msk.bf16.vlgmr.msra.gmra.mrb[80].mxu1 %vm641_vm2, %v1864_v22  ;;  %v2873_v38 = vpop.f32.mrb[71].mxu1 }
 0x396   :  { %2917 = vmatpush3.bf16.xpose.msra.mxu1 %v2013_v37  ;;  %2918 = vmatprep.mubr.msk.bf16.mxu1 %vm3096_vm0, %v3095_v1 }
 0x397   :  { %2928 = vmatprep.subr.bf16.mxu1 %v3095_v1  ;;  %2889 = vmatmul.mubr.msk.bf16.vlgmr.msra.gmra.mrb[48].mxu0 %vm61_vm1, %v3381_v28 }
 0x398   :  { %2900 = vmatprep.mubr.msk.bf16.mxu0 %vm3096_vm0, %v3095_v1 }
 0x39a   :  { %v1765_v41 = vpop.f32.mrb[72].mxu1 }
 0x39b   :  { %v2102_v42 = vpack.c.bf16 %v1765_v41, %v1765_v41  ;;  %v2884_v43 = vpop.f32.mrb[73].mxu1 }
 0x39c   :  { %v1768_v44 = vpop.f32.mrb[74].mxu1 }
 0x39d   :  { %2919 = vmatmul.mubr.msk.bf16.vlgmr.msra.gmra.mrb[84].mxu1 %vm641_vm2, %v1866_v39  ;;  %v2155_v45 = vsel %vm879_vm3, %v2102_v42, 0  ;;  %v2885_v46 = vpop.f32.mrb[75].mxu1 }
 0x39e   :  { %2930 = vmatprep.mubr.msk.bf16.mxu1 %vm3096_vm0, %v3095_v1  ;;  %2929 = vmatpush3.bf16.msra.mxu1 %v2155_v45 }
 0x39f   :  { %2940 = vmatprep.subr.bf16.mxu1 %v3095_v1 }
 0x3a2   :  { %v3470_v47 = vpop.f32.mrb[76].mxu1 }
 0x3a3   :  { %v2896_v48 = vpop.f32.mrb[77].mxu1  ;;  %v2104_v36 = vpack.c.bf16 %v3470_v47, %v3470_v47 }
 0x3a4   :  { %v1860_v49 = vpop.f32.mrb[78].mxu1 }
 0x3a5   :  { %v2897_v50 = vpop.f32.mrb[79].mxu1  ;;  %v2247_v38 = vsel %vm879_vm3, %v2104_v36, 0 }
 0x44a   :  { %v1255_v51 = vpop.f32.mrb[32].mxu0 }
 0x44b   :  { %1264 = vst [vmem:[#allocation4] sm:$0xff] %v1255_v51  ;;  %v2824_v28 = vpop.f32.mrb[33].mxu0 }
 0x44c   :  { %v1258_v52 = vpop.f32.mrb[34].mxu0 }
 0x44d   :  { %v2825_v53 = vpop.f32.mrb[35].mxu0 }
 0x452   :  { %v1524_v55 = vpop.f32.mrb[36].mxu0 }
 0x453   :  { %v1867_v56 = vpack.c.bf16 %v1524_v55, %v1524_v55  ;;  %v2854_v57 = vpop.f32.mrb[37].mxu0 }
 0x454   :  { %v1527_v58 = vpop.f32.mrb[38].mxu0 }
 0x455   :  { %v1875_v59 = vsel %vm641_vm2, %v1867_v56, 0  ;;  %v2855_v60 = vpop.f32.mrb[39].mxu0 }
 0x456   :  { %2899 = vmatpush3.bf16.xpose.msra.mxu0 %v1875_v59 }
 0x457   :  { %2910 = vmatprep.subr.bf16.mxu0 %v3095_v1 }
 0x45a   :  { %v1616_v61 = vpop.f32.mrb[40].mxu0 }
 0x45b   :  { %v1869_v54 = vpack.c.bf16 %v1616_v61, %v1616_v61  ;;  %v2866_v63 = vpop.f32.mrb[41].mxu0 }
 0x45c   :  { %v1619_v0 = vpop.f32.mrb[42].mxu0 }
 0x45d   :  { %v1967_v3 = vsel %vm641_vm2, %v1869_v54, 0  ;;  %2901 = vmatmul.mubr.msk.bf16.vlgmr.msra.gmra.mrb[52].mxu0 %vm641_vm2, %v1863_v62  ;;  %v2867_v4 = vpop.f32.mrb[43].mxu0 }
 0x45e   :  { %2911 = vmatpush3.bf16.xpose.msra.mxu0 %v1967_v3  ;;  %2912 = vmatprep.mubr.msk.bf16.mxu0 %vm3096_vm0, %v3095_v1 }
 0x45f   :  { %2922 = vmatprep.subr.bf16.mxu0 %v3095_v1 }
 0x462   :  { %v1719_v18 = vpop.f32.mrb[44].mxu0 }
 0x463   :  { %v2101_v19 = vpack.c.bf16 %v1719_v18, %v1719_v18  ;;  %v2878_v20 = vpop.f32.mrb[45].mxu0 }
 0x464   :  { %v1722_v23 = vpop.f32.mrb[46].mxu0 }
 0x465   :  { %2913 = vmatmul.mubr.msk.bf16.vlgmr.msra.gmra.mrb[56].mxu0 %vm641_vm2, %v1865_v5  ;;  %v2109_v24 = vsel %vm879_vm3, %v2101_v19, 0  ;;  %v2879_v25 = vpop.f32.mrb[47].mxu0  ;;  %v2302_v19 = vld [vmem:[%s3573_s7 + $0x4] sm:$0xf] }
 0x466   :  { %2924 = vmatprep.mubr.msk.bf16.mxu0 %vm3096_vm0, %v3095_v1  ;;  %2923 = vmatpush3.bf16.msra.mxu0 %v2109_v24 }
 0x467   :  { %2934 = vmatprep.subr.bf16.mxu0 %v3095_v1 }
 0x468   :  { %v1957_v7 = vpop.f32.mrb[80].mxu1 }
 0x469   :  { %v2058_v8 = vsel %vm3486_vm5, %v1957_v7, -1000000.0  ;;  %v2908_v9 = vpop.f32.mrb[81].mxu1 }
 0x46a   :  { %v2064_v10 = vsel %vm641_vm2, %v2058_v8, -inf  ;;  %v1960_v11 = vpop.f32.mrb[82].mxu1  ;;  %v1811_v26 = vpop.f32.mrb[48].mxu0 }
 0x46b   :  { %2065 = vmax.xlane.f32.xlu1 %v2064_v10  ;;  %v2909_v12 = vpop.f32.mrb[83].mxu1  ;;  %v2890_v27 = vpop.f32.mrb[49].mxu0  ;;  %v2103_v62 = vpack.c.bf16 %v1811_v26, %v1811_v26 }
 0x46c   :  { %v1814_v29 = vpop.f32.mrb[50].mxu0  ;;  %v2355_v27 = vsel %vm879_vm3, %v2302_v19, 0 }
 0x46d   :  { %v2891_v30 = vpop.f32.mrb[51].mxu0  ;;  %v2201_v3 = vsel %vm879_vm3, %v2103_v62, 0 }
 0x470   :  { %v2049_v13 = vpop.f32.mrb[84].mxu1 }
 0x471   :  { %v2060_v21 = vsel %vm3486_vm5, %v2049_v13, -1000000.0  ;;  %v2920_v14 = vpop.f32.mrb[85].mxu1  ;;  %v2301_v13 = vld [vmem:[%s3573_s7] sm:$0xf] }
 0x472   :  { %v2070_v15 = vsel %vm641_vm2, %v2060_v21, -inf  ;;  %v2052_v16 = vpop.f32.mrb[86].mxu1  ;;  %v2309_v14 = vsel %vm879_vm3, %v2301_v13, 0 }
 0x473   :  { %2071 = vmax.xlane.f32.xlu1 %v2070_v15  ;;  %v2921_v17 = vpop.f32.mrb[87].mxu1 }
 0x4f8   :  { %v2066_v31 = vpop.xlane.xlu1 %2065 }
 0x4f9   :  { %v2074_v32 = vsub.f32 %v2058_v8, %v2066_v31 }
 0x4fb   :  { %v2079_v22 = vmul.f32 1.442695, %v2074_v32 }
 0x4fd   :  { %3040 = vpow2.f32 %v2079_v22 }
 0x500   :  { %v2072_v33 = vpop.xlane.xlu1 %2071 }
 0x501   :  { %v2076_v34 = vsub.f32 %v2060_v21, %v2072_v33 }
 0x503   :  { %v2083_v35 = vmul.f32 1.442695, %v2076_v34 }
 0x505   :  { %3042 = vpow2.f32 %v2083_v35  ;;  %v2303_v35 = vld [vmem:[%s3573_s7 + $0x8] sm:$0xf] }
 0x507   :  { %v3041_v37 = vpop.eup %3040 }
 0x508   :  { %v2098_v39 = vpack.c.bf16 %v3041_v37, %v3041_v37  ;;  %v2088_v40 = vsel %vm641_vm2, %v3041_v37, 0.0  ;;  %v2401_v37 = vsel %vm879_vm3, %v2303_v35, 0 }
 0x509   :  { %2089 = vadd.xlane.f32.xlu1 %v2088_v40 }
 0x50a   :  { %2931 = vmatmul.mubr.msk.bf16.vlgmr.msra.gmra.mrb[88].mxu1 %vm641_vm2, %v2098_v39 }
 0x50b   :  { %2941 = vmatpush3.bf16.msra.mxu1 %v2247_v38  ;;  %2942 = vmatprep.mubr.msk.bf16.mxu1 %vm3096_vm0, %v3095_v1 }
 0x50f   :  { %v3043_v41 = vpop.eup %3042 }
 0x510   :  { %v2100_v42 = vpack.c.bf16 %v3043_v41, %v3043_v41  ;;  %v2094_v43 = vsel %vm641_vm2, %v3043_v41, 0.0  ;;  %v2304_v41 = vld [vmem:[%s3573_s7 + $0xc] sm:$0xf]  ;;  %s3068_s7 = scalar_lea.vmem %s2500_s11, 256 }
 0x511   :  { %2095 = vadd.xlane.f32.xlu1 %v2094_v43  ;;  %v2447_v43 = vsel %vm879_vm3, %v2304_v41, 0  ;;  %p3069_p5 = scmp.ne.s32.totalorder %s2500_s11, %s3068_s7  ;;  %p3074_p7 = scmp.lt.s32.totalorder %s3068_s7, %s3068_s7 }
 0x512   :  { %2943 = vmatmul.mubr.msk.bf16.vlgmr.msra.gmra.mrb[92].mxu1 %vm641_vm2, %v2100_v42 }
 0x513   :  { %p3075_p8 = por %p3074_p7, %p3073_p6 }
 0x515   :  { %p3076_p9 = pnand %p3075_p8, %p3069_p5 }
 0x530   :  { %v1911_v44 = vpop.f32.mrb[52].mxu0 }
 0x531   :  { %v2057_v45 = vsel %vm3486_vm5, %v1911_v44, -1000000.0  ;;  %v2902_v46 = vpop.f32.mrb[53].mxu0 }
 0x532   :  { %v1914_v47 = vpop.f32.mrb[54].mxu0  ;;  %v2061_v48 = vsel %vm641_vm2, %v2057_v45, -inf }
 0x533   :  { %2062 = vmax.xlane.f32.xlu0 %v2061_v48  ;;  %v2903_v49 = vpop.f32.mrb[55].mxu0 }
 0x538   :  { %v2003_v50 = vpop.f32.mrb[56].mxu0 }
 0x539   :  { %v2059_v51 = vsel %vm3486_vm5, %v2003_v50, -1000000.0  ;;  %v2914_v28 = vpop.f32.mrb[57].mxu0 }
 0x53a   :  { %v2006_v52 = vpop.f32.mrb[58].mxu0  ;;  %v2067_v53 = vsel %vm641_vm2, %v2059_v51, -inf }
 0x53b   :  { %2068 = vmax.xlane.f32.xlu0 %v2067_v53  ;;  %v2915_v55 = vpop.f32.mrb[59].mxu0 }
 0x596   :  { %v2090_v16 = vpop.xlane.xlu1 %2089 }
 0x59e   :  { %v2096_v38 = vpop.xlane.xlu1 %2095 }
 0x5c0   :  { %v2063_v56 = vpop.xlane.xlu0 %2062 }
 0x5c1   :  { %v2073_v57 = vsub.f32 %v2057_v45, %v2063_v56 }
 0x5c3   :  { %v2077_v58 = vmul.f32 1.442695, %v2073_v57 }
 0x5c5   :  { %3044 = vpow2.f32 %v2077_v58 }
 0x5c8   :  { %v2069_v59 = vpop.xlane.xlu0 %2068 }
 0x5c9   :  { %v2075_v60 = vsub.f32 %v2059_v51, %v2069_v59 }
 0x5cb   :  { %v2081_v61 = vmul.f32 1.442695, %v2075_v60 }
 0x5cd   :  { %3046 = vpow2.f32 %v2081_v61 }
 0x5cf   :  { %v3045_v54 = vpop.eup %3044 }
 0x5d0   :  { %v2085_v63 = vsel %vm641_vm2, %v3045_v54, 0.0  ;;  %v2097_v0 = vpack.c.bf16 %v3045_v54, %v3045_v54 }
 0x5d1   :  { %2086 = vadd.xlane.f32.xlu0 %v2085_v63 }
 0x5d2   :  { %2925 = vmatmul.mubr.msk.bf16.vlgmr.msra.gmra.mrb[60].mxu0 %vm641_vm2, %v2097_v0 }
 0x5d3   :  { %2935 = vmatpush3.bf16.msra.mxu0 %v2201_v3  ;;  %2936 = vmatprep.mubr.msk.bf16.mxu0 %vm3096_vm0, %v3095_v1 }
 0x5d4   :  { %2946 = vmatprep.subr.bf16.mxu0 %v3095_v1 }
 0x5d7   :  { %v3047_v4 = vpop.eup %3046 }
 0x5d8   :  { %v2091_v5 = vsel %vm641_vm2, %v3047_v4, 0.0  ;;  %v2099_v6 = vpack.c.bf16 %v3047_v4, %v3047_v4 }
 0x5d9   :  { %2092 = vadd.xlane.f32.xlu0 %v2091_v5 }
 0x5da   :  { %2937 = vmatmul.mubr.msk.bf16.vlgmr.msra.gmra.mrb[64].mxu0 %vm641_vm2, %v2099_v6 }
 0x5db   :  { %2948 = vmatprep.mubr.msk.bf16.mxu0 %vm3096_vm0, %v3095_v1  ;;  %2947 = vmatpush3.bf16.msra.mxu0 %v2309_v14 }
 0x5dc   :  { %2952 = vmatprep.subr.bf16.mxu0 %v3095_v1 }
 0x5dd   :  { %v2191_v2 = vpop.f32.mrb[88].mxu1 }
 0x5de   :  { %v2932_v7 = vpop.f32.mrb[89].mxu1 }
 0x5df   :  { %v2194_v8 = vpop.f32.mrb[90].mxu1 }
 0x5e0   :  { %v2933_v9 = vpop.f32.mrb[91].mxu1 }
 0x5e5   :  { %v2283_v10 = vpop.f32.mrb[92].mxu1 }
 0x5e6   :  { %v2944_v11 = vpop.f32.mrb[93].mxu1 }
 0x5e7   :  { %v2286_v12 = vpop.f32.mrb[94].mxu1 }
 0x5e8   :  { %v2945_v21 = vpop.f32.mrb[95].mxu1 }
 0x65e   :  { %v2087_v15 = vpop.xlane.xlu0 %2086 }
 0x65f   :  { %3048 = vrcp.f32 %v2087_v15 }
 0x660   :  { %3050 = vrcp.f32 %v2090_v16 }
 0x666   :  { %v2093_v30 = vpop.xlane.xlu0 %2092 }
 0x667   :  { %3052 = vrcp.f32 %v2093_v30 }
 0x668   :  { %3054 = vrcp.f32 %v2096_v38 }
 0x669   :  { %v3049_v17 = vpop.eup %3048 }
 0x66a   :  { %v3051_v32 = vpop.eup %3050 }
 0x66b   :  { %v2294_v33 = vmul.f32 %v3051_v32, %v2191_v2 }
 0x66d   :  { %v2298_v36 = vpack.c.bf16 %v2294_v33, %v2294_v33 }
 0x671   :  { %v3053_v39 = vpop.eup %3052 }
 0x672   :  { %v3055_v44 = vpop.eup %3054 }
 0x673   :  { %v2296_v45 = vmul.f32 %v3055_v44, %v2283_v10 }
 0x675   :  { %v2300_v46 = vpack.c.bf16 %v2296_v45, %v2296_v45 }
 0x6a5   :  { %v2145_v18 = vpop.f32.mrb[60].mxu0 }
 0x6a6   :  { %v2293_v20 = vmul.f32 %v3049_v17, %v2145_v18  ;;  %v2926_v23 = vpop.f32.mrb[61].mxu0 }
 0x6a7   :  { %v2148_v24 = vpop.f32.mrb[62].mxu0 }
 0x6a8   :  { %v2297_v25 = vpack.c.bf16 %v2293_v20, %v2293_v20  ;;  %v2927_v26 = vpop.f32.mrb[63].mxu0 }
 0x6aa   :  { %2949 = vmatmul.mubr.msk.bf16.vlgmr.msra.gmra.mrb[68].mxu0 %vm641_vm2, %v2297_v25 }
 0x6ab   :  { %2953 = vmatpush3.bf16.msra.mxu0 %v2355_v27  ;;  %2954 = vmatprep.mubr.msk.bf16.mxu0 %vm3096_vm0, %v3095_v1 }
 0x6ac   :  { %2958 = vmatprep.subr.bf16.mxu0 %v3095_v1 }
 0x6ad   :  { %v2237_v29 = vpop.f32.mrb[64].mxu0 }
 0x6ae   :  { %v2938_v31 = vpop.f32.mrb[65].mxu0  ;;  %v2295_v40 = vmul.f32 %v3053_v39, %v2237_v29 }
 0x6af   :  { %v2240_v22 = vpop.f32.mrb[66].mxu0 }
 0x6b0   :  { %v2939_v34 = vpop.f32.mrb[67].mxu0  ;;  %v2299_v42 = vpack.c.bf16 %v2295_v40, %v2295_v40 }
 0x6b6   :  { %2955 = vmatmul.mubr.msk.bf16.vlgmr.msra.gmra.mrb[68].mxu0 %vm641_vm2, %v2298_v36 }
 0x6b7   :  { %2959 = vmatpush3.bf16.msra.mxu0 %v2401_v37  ;;  %2960 = vmatprep.mubr.msk.bf16.mxu0 %vm3096_vm0, %v3095_v1 }
 0x6b8   :  { %2964 = vmatprep.subr.bf16.mxu0 %v3095_v1 }
 0x6c2   :  { %2961 = vmatmul.mubr.msk.bf16.vlgmr.msra.gmra.mrb[68].mxu0 %vm641_vm2, %v2299_v42 }
 0x6c3   :  { %2965 = vmatpush3.bf16.msra.mxu0 %v2447_v43  ;;  %2966 = vmatprep.mubr.msk.bf16.mxu0 %vm3096_vm0, %v3095_v1 }
 0x6ce   :  { %2967 = vmatmul.mubr.msk.bf16.vlgmr.msra.gmra.mrb[68].mxu0 %vm641_vm2, %v2300_v46 }
 0x7a1   :  { %v2483_v47 = vpop.f32.mrb[68].mxu0 }
 0x7a2   :  { %2493 = vst [vmem:[#allocation4 + $0x8] sm:$0xff] %v2483_v47  ;;  %v2968_v48 = vpop.f32.mrb[69].mxu0 }
 0x7a3   :  { %v2486_v49 = vpop.f32.mrb[70].mxu0 }
 0x7a4   :  { %3079 = shalt.err (!%p3076_p9)
}
 0x7a5   :  { %s3080_s13 = scalar_lea.hbm %s3574_s8, 256 }
 0x7a6   :  { %p3081_p10 = scmp.ne.s32.totalorder %s3574_s8, %s3080_s13  ;;  %p3084_p11 = scmp.lt.u32.totalorder %s3080_s13, %s3574_s8 }
 0x7a8   :  { %p3086_p12 = pnand %p3084_p11, %p3081_p10 }
 0x7aa   :  { %3089 = shalt.err (!%p3086_p12)
}
 0x7ab   :  { %s3098_s17 = smov 128   ;;  %s3099_s18 = smov 8   ;;  %v2969_v1 = vpop.f32.mrb[71].mxu0 }
 0x7ac   :  { %2505 = dma.vmem_to_hbm [thread:$0]  %s2500_s11, 256, %s3574_s8, [#allocation5], %s3098_s17, %s3098_s17, %s3099_s18  }
 0x7ad   :  { %3092 = dma.done.wait [#allocation5], 256  }
 0x7ae   :  { %3093 = vsyncadd [#allocation5], 4294967040 }
 0x7af   :  { %2509 = vsyncpa [#allocation5], 1 }

</bundles_post_ra>
